<compile_context>
chip_gen: v5e
topology: v5e:2x2
jax: 0.10.0
libtpu: 0.0.40
codegen_flags: <defaults>
</compile_context>

<pallas_src>
import functools

import jax
import jax.numpy as jnp
from jax.experimental import pallas as pl
from jax.experimental.pallas import tpu as pltpu


_LANE = 128
_MAX_LANE_TILE = 1024              # 512-1024 wide lane tiles ~= HBM roofline (v6e measured)
_MAX_BLOCK_BYTES = 2 * 1024 * 1024  # one (1, C, tile) f32 block; 4 live buffers stay < 16 MiB


def _choose_hw_tiling(hw, c, itemsize=4):
    """Pad HW up to a multiple of 128 and pick the largest lane tile that
    (a) evenly divides the padded extent (so reduction blocks are in-bounds),
    (b) is <= _MAX_LANE_TILE and (c) keeps one block under _MAX_BLOCK_BYTES."""
    hw_pad = ((hw + _LANE - 1) // _LANE) * _LANE
    n = hw_pad // _LANE
    best = 1
    for d in range(1, n + 1):
        tile = d * _LANE
        if n % d == 0 and tile <= _MAX_LANE_TILE and c * tile * itemsize <= _MAX_BLOCK_BYTES:
            best = d
    return hw_pad, best * _LANE


# --------------------------------------------------------------------------
# Pass 1: tiled global-average-pool (channel sums; divide by true HW outside)
# --------------------------------------------------------------------------
def _pool_sum_kernel(x_ref, sum_ref):
    # x_ref: (1, C, hw_tile)   sum_ref: (1, C, 1) resident across the hw axis
    @pl.when(pl.program_id(1) == 0)
    def _init():
        sum_ref[...] = jnp.zeros_like(sum_ref)

    sum_ref[...] += jnp.sum(x_ref[...], axis=-1, keepdims=True)


# --------------------------------------------------------------------------
# Pass 2: squeeze/excite MLP (tiny: (B,C)@(C,C/4), (B,C/4)@(C/4,C) + sigmoid)
# --------------------------------------------------------------------------
def _se_mlp_kernel(p_ref, w0_ref, b0_ref, w1_ref, b1_ref, s_ref):
    # p_ref: (B, C)  w0_ref: (C, C4)  b0_ref: (1, C4)  w1_ref: (C4, C)  b1_ref: (1, C)
    h = jnp.dot(p_ref[...], w0_ref[...],
                preferred_element_type=jnp.float32) + b0_ref[...]
    h = jnp.maximum(h, 0.0)
    z = jnp.dot(h, w1_ref[...],
                preferred_element_type=jnp.float32) + b1_ref[...]
    # exact sigmoid: this op is negligible (<0.1% of work) so keep full precision
    s_ref[...] = 1.0 / (1.0 + jnp.exp(-z))


# --------------------------------------------------------------------------
# Pass 3: tiled broadcast channel-scale (the HBM-bandwidth-bound part)
# --------------------------------------------------------------------------
def _scale_kernel(x_ref, s_ref, o_ref):
    # x_ref: (1, C, hw_tile)   s_ref: (1, C, 1) -> lane-broadcast multiply
    o_ref[...] = x_ref[...] * s_ref[...]


@jax.jit
def se_layer(x, w0_t, b0_2d, w1_t, b1_2d):
    """SE forward.  x: (B, C, H, W) f32.
    Weights are pre-transposed to (in, out) and biases reshaped to (1, out)
    once outside the hot path (see prepare_params)."""
    B, C, H, W = x.shape
    HW = H * W
    HWp, hw_tile = _choose_hw_tiling(HW, C)
    n_hw = HWp // hw_tile

    x_flat = x.reshape(B, C, HW)
    if HWp != HW:
        x_flat = jnp.pad(x_flat, ((0, 0), (0, 0), (0, HWp - HW)))

    # ---- pass 1: channel sums over the spatial axis ----------------------
    sums = pl.pallas_call(
        _pool_sum_kernel,
        out_shape=jax.ShapeDtypeStruct((B, C, 1), jnp.float32),
        grid_spec=pltpu.PrefetchScalarGridSpec(
            num_scalar_prefetch=0,
            grid=(B, n_hw),
            in_specs=[pl.BlockSpec((1, C, hw_tile), lambda b, h: (b, 0, h))],
            out_specs=pl.BlockSpec((1, C, 1), lambda b, h: (b, 0, 0)),
        ),
        compiler_params=pltpu.CompilerParams(
            dimension_semantics=("parallel", "arbitrary")),
    )(x_flat)

    # true-HW mean (zero padding does not change the sums)
    pooled = sums[:, :, 0] * (1.0 / HW)

    # ---- pass 2: squeeze/excite MLP (computed once, not per tile) --------
    s = pl.pallas_call(
        _se_mlp_kernel,
        out_shape=jax.ShapeDtypeStruct((B, C), jnp.float32),
    )(pooled, w0_t, b0_2d, w1_t, b1_2d)

    # ---- pass 3: broadcast channel-scale of x -----------------------------
    # NOTE: input_output_aliases={0: 0} (suggested in review) is intentionally
    # omitted: when HW needs no padding, x_flat may alias the non-donated
    # caller input and XLA would insert a full defensive copy, adding traffic.
    out_flat = pl.pallas_call(
        _scale_kernel,
        out_shape=jax.ShapeDtypeStruct((B, C, HWp), jnp.float32),
        grid_spec=pltpu.PrefetchScalarGridSpec(
            num_scalar_prefetch=0,
            grid=(B, n_hw),
            in_specs=[pl.BlockSpec((1, C, hw_tile), lambda b, h: (b, 0, h)),
                      pl.BlockSpec((1, C, 1), lambda b, h: (b, 0, 0))],
            out_specs=pl.BlockSpec((1, C, hw_tile), lambda b, h: (b, 0, h)),
        ),
        compiler_params=pltpu.CompilerParams(
            dimension_semantics=("parallel", "parallel")),
    )(x_flat, s.reshape(B, C, 1))

    return out_flat[:, :, :HW].reshape(B, C, H, W)


# --------------------------------------------------------------------------
# Parameter helpers (mirroring the PyTorch module's shapes) and reference
# --------------------------------------------------------------------------
def _init_params(key, out_channel, factor=0.01):
    c4 = out_channel // 4
    k0, k1, k2, k3 = jax.random.split(key, 4)
    w0 = jax.random.normal(k0, (c4, out_channel), jnp.float32) * factor   # (out, in)
    b0 = jax.random.normal(k1, (c4,), jnp.float32) * factor
    w1 = jax.random.normal(k2, (out_channel, c4), jnp.float32) * factor   # (out, in)
    b1 = jax.random.normal(k3, (out_channel,), jnp.float32) * factor
    return w0, b0, w1, b1


def prepare_params(w0, b0, w1, b1):
    """One-time prep outside the jitted hot path: (out,in)->(in,out), 2-D biases."""
    return w0.T, b0.reshape(1, -1), w1.T, b1.reshape(1, -1)


def _reference(x, w0, b0, w1, b1):
    pooled = jnp.mean(x, axis=(2, 3))
    h = jnp.maximum(pooled @ w0.T + b0, 0.0)
    s = jax.nn.sigmoid(h @ w1.T + b1)
    return s[:, :, None, None] * x


if __name__ == "__main__":
    key = jax.random.PRNGKey(0)
    k_x, k_p = jax.random.split(key)

    # HW = 2025 -> padded to 2048, lane tile 1024, 2 spatial grid steps per
    # batch item: exercises both the padded path and multi-step accumulation.
    B, C, H, W = 2, 64, 45, 45
    x = jax.random.normal(k_x, (B, C, H, W), jnp.float32)
    w0, b0, w1, b1 = _init_params(k_p, C)
    w0_t, b0_2d, w1_t, b1_2d = prepare_params(w0, b0, w1, b1)

    out = se_layer(x, w0_t, b0_2d, w1_t, b1_2d)
    out = jax.block_until_ready(out)

    ref = _reference(x, w0, b0, w1, b1)
    assert out.shape == (B, C, H, W)
    assert jnp.allclose(out, ref, atol=1e-5, rtol=1e-5), "mismatch vs reference"

    print("KERNEL_OK")
</pallas_src>

<mosaic_0001>
module attributes {stable_mosaic.version = 11 : i64} {
  func.func @_pool_sum_kernel(%arg0: i32, %arg1: i32, %arg2: memref<1x64x1024xf32, #tpu.memory_space<vmem>>, %arg3: memref<1x64x1xf32, #tpu.memory_space<vmem>>) attributes {dimension_semantics = [#tpu.dimension_semantics<parallel>, #tpu.dimension_semantics<arbitrary>], iteration_bounds = array<i64: 2, 2>, scalar_prefetch = 0 : i64, scratch_operands = 0 : i64, tpu.core_type = #tpu.core_type<tc>, window_params = [{transform_indices = @transform_0, window_bounds = array<i64: 1, 64, 1024>}, {transform_indices = @transform_1, window_bounds = array<i64: 1, 64, 1>}]} {
    %c0_i32 = arith.constant 0 : i32
    %0 = arith.cmpi eq, %arg1, %c0_i32 : i32
    %1 = arith.extui %0 : i1 to i32
    %c0_i32_0 = arith.constant 0 : i32
    %2 = arith.cmpi ne, %1, %c0_i32_0 : i32
    scf.if %2 {
      %cst_9 = arith.constant 0.000000e+00 : f32
      %9 = vector.broadcast %cst_9 : f32 to vector<1x64x1xf32>
      %c0_10 = arith.constant 0 : index
      %c0_11 = arith.constant 0 : index
      %c0_12 = arith.constant 0 : index
      %10 = vector.load %arg3[%c0_10, %c0_11, %c0_12] : memref<1x64x1xf32, #tpu.memory_space<vmem>>, vector<1x64x1xf32>
      tpu.vector_store %arg3[%c0_10, %c0_11, %c0_12], %9 {strides = array<i32>} : memref<1x64x1xf32, #tpu.memory_space<vmem>>, vector<1x64x1xf32>,
    } else {
    }
    %c0 = arith.constant 0 : index
    %c0_1 = arith.constant 0 : index
    %c0_2 = arith.constant 0 : index
    %3 = vector.load %arg3[%c0, %c0_1, %c0_2] : memref<1x64x1xf32, #tpu.memory_space<vmem>>, vector<1x64x1xf32>
    %c0_3 = arith.constant 0 : index
    %c0_4 = arith.constant 0 : index
    %c0_5 = arith.constant 0 : index
    %4 = vector.load %arg2[%c0_3, %c0_4, %c0_5] : memref<1x64x1024xf32, #tpu.memory_space<vmem>>, vector<1x64x1024xf32>
    %cst = arith.constant dense<0.000000e+00> : vector<1x64xf32>
    %5 = vector.multi_reduction <add>, %4, %cst [2] : vector<1x64x1024xf32> to vector<1x64xf32>
    %6 = vector.shape_cast %5 : vector<1x64xf32> to vector<1x64x1xf32>
    %7 = arith.addf %3, %6 : vector<1x64x1xf32>
    %c0_6 = arith.constant 0 : index
    %c0_7 = arith.constant 0 : index
    %c0_8 = arith.constant 0 : index
    %8 = vector.load %arg3[%c0_6, %c0_7, %c0_8] : memref<1x64x1xf32, #tpu.memory_space<vmem>>, vector<1x64x1xf32>
    tpu.vector_store %arg3[%c0_6, %c0_7, %c0_8], %7 {strides = array<i32>} : memref<1x64x1xf32, #tpu.memory_space<vmem>>, vector<1x64x1xf32>,
    return
  }
  func.func @transform_0(%arg0: i32, %arg1: i32) -> (i32, i32, i32) {
    %c0_i32 = arith.constant 0 : i32
    %c0_i32_0 = arith.constant 0 : i32
    return %arg0, %c0_i32, %arg1 : i32, i32, i32
  }
  func.func @transform_1(%arg0: i32, %arg1: i32) -> (i32, i32, i32) {
    %c0_i32 = arith.constant 0 : i32
    %c0_i32_0 = arith.constant 0 : i32
    %c0_i32_1 = arith.constant 0 : i32
    return %arg0, %c0_i32, %c0_i32_0 : i32, i32, i32
  }
}

module attributes {stable_mosaic.version = 11 : i64} {
  func.func @_se_mlp_kernel(%arg0: memref<2x64xf32, #tpu.memory_space<vmem>>, %arg1: memref<64x16xf32, #tpu.memory_space<vmem>>, %arg2: memref<1x16xf32, #tpu.memory_space<vmem>>, %arg3: memref<16x64xf32, #tpu.memory_space<vmem>>, %arg4: memref<1x64xf32, #tpu.memory_space<vmem>>, %arg5: memref<2x64xf32, #tpu.memory_space<vmem>>) attributes {dimension_semantics = [], scalar_prefetch = 0 : i64, scratch_operands = 0 : i64, tpu.core_type = #tpu.core_type<tc>} {
    %c0 = arith.constant 0 : index
    %c0_0 = arith.constant 0 : index
    %0 = vector.load %arg0[%c0, %c0_0] : memref<2x64xf32, #tpu.memory_space<vmem>>, vector<2x64xf32>
    %c0_1 = arith.constant 0 : index
    %c0_2 = arith.constant 0 : index
    %1 = vector.load %arg1[%c0_1, %c0_2] : memref<64x16xf32, #tpu.memory_space<vmem>>, vector<64x16xf32>
    %cst = arith.constant dense<0.000000e+00> : vector<2x16xf32>
    %2 = tpu.matmul %0, %1, %cst {dimension_numbers = #tpu.dot_dimension_numbers<[1], [0], [0], [1], [0, 0, 1, 1], [], []>} : vector<2x64xf32>, vector<64x16xf32>, vector<2x16xf32> -> vector<2x16xf32>
    %c0_3 = arith.constant 0 : index
    %c0_4 = arith.constant 0 : index
    %3 = vector.load %arg2[%c0_3, %c0_4] : memref<1x16xf32, #tpu.memory_space<vmem>>, vector<1x16xf32>
    %4 = vector.broadcast %3 : vector<1x16xf32> to vector<2x16xf32>
    %5 = arith.addf %2, %4 : vector<2x16xf32>
    %cst_5 = arith.constant 0.000000e+00 : f32
    %6 = vector.broadcast %cst_5 : f32 to vector<2x16xf32>
    %7 = arith.maximumf %5, %6 : vector<2x16xf32>
    %c0_6 = arith.constant 0 : index
    %c0_7 = arith.constant 0 : index
    %8 = vector.load %arg3[%c0_6, %c0_7] : memref<16x64xf32, #tpu.memory_space<vmem>>, vector<16x64xf32>
    %cst_8 = arith.constant dense<0.000000e+00> : vector<2x64xf32>
    %9 = tpu.matmul %7, %8, %cst_8 {dimension_numbers = #tpu.dot_dimension_numbers<[1], [0], [0], [1], [0, 0, 1, 1], [], []>} : vector<2x16xf32>, vector<16x64xf32>, vector<2x64xf32> -> vector<2x64xf32>
    %c0_9 = arith.constant 0 : index
    %c0_10 = arith.constant 0 : index
    %10 = vector.load %arg4[%c0_9, %c0_10] : memref<1x64xf32, #tpu.memory_space<vmem>>, vector<1x64xf32>
    %11 = vector.broadcast %10 : vector<1x64xf32> to vector<2x64xf32>
    %12 = arith.addf %9, %11 : vector<2x64xf32>
    %cst_11 = arith.constant 0.000000e+00 : f32
    %13 = vector.broadcast %cst_11 : f32 to vector<2x64xf32>
    %14 = arith.subf %13, %12 : vector<2x64xf32>
    %15 = math.exp %14 : vector<2x64xf32>
    %cst_12 = arith.constant 1.000000e+00 : f32
    %16 = vector.broadcast %cst_12 : f32 to vector<2x64xf32>
    %17 = arith.addf %16, %15 : vector<2x64xf32>
    %cst_13 = arith.constant 1.000000e+00 : f32
    %18 = vector.broadcast %cst_13 : f32 to vector<2x64xf32>
    %19 = arith.divf %18, %17 : vector<2x64xf32>
    %c0_14 = arith.constant 0 : index
    %c0_15 = arith.constant 0 : index
    %20 = vector.load %arg5[%c0_14, %c0_15] : memref<2x64xf32, #tpu.memory_space<vmem>>, vector<2x64xf32>
    tpu.vector_store %arg5[%c0_14, %c0_15], %19 {strides = array<i32>} : memref<2x64xf32, #tpu.memory_space<vmem>>, vector<2x64xf32>,
    return
  }
}

module attributes {stable_mosaic.version = 11 : i64} {
  func.func @_scale_kernel(%arg0: i32, %arg1: i32, %arg2: memref<1x64x1024xf32, #tpu.memory_space<vmem>>, %arg3: memref<1x64x1xf32, #tpu.memory_space<vmem>>, %arg4: memref<1x64x1024xf32, #tpu.memory_space<vmem>>) attributes {dimension_semantics = [#tpu.dimension_semantics<parallel>, #tpu.dimension_semantics<parallel>], iteration_bounds = array<i64: 2, 2>, scalar_prefetch = 0 : i64, scratch_operands = 0 : i64, tpu.core_type = #tpu.core_type<tc>, window_params = [{transform_indices = @transform_0, window_bounds = array<i64: 1, 64, 1024>}, {transform_indices = @transform_1, window_bounds = array<i64: 1, 64, 1>}, {transform_indices = @transform_2, window_bounds = array<i64: 1, 64, 1024>}]} {
    %c0 = arith.constant 0 : index
    %c0_0 = arith.constant 0 : index
    %c0_1 = arith.constant 0 : index
    %0 = vector.load %arg2[%c0, %c0_0, %c0_1] : memref<1x64x1024xf32, #tpu.memory_space<vmem>>, vector<1x64x1024xf32>
    %c0_2 = arith.constant 0 : index
    %c0_3 = arith.constant 0 : index
    %c0_4 = arith.constant 0 : index
    %1 = vector.load %arg3[%c0_2, %c0_3, %c0_4] : memref<1x64x1xf32, #tpu.memory_space<vmem>>, vector<1x64x1xf32>
    %2 = vector.broadcast %1 : vector<1x64x1xf32> to vector<1x64x1024xf32>
    %3 = arith.mulf %0, %2 : vector<1x64x1024xf32>
    %c0_5 = arith.constant 0 : index
    %c0_6 = arith.constant 0 : index
    %c0_7 = arith.constant 0 : index
    %4 = vector.load %arg4[%c0_5, %c0_6, %c0_7] : memref<1x64x1024xf32, #tpu.memory_space<vmem>>, vector<1x64x1024xf32>
    tpu.vector_store %arg4[%c0_5, %c0_6, %c0_7], %3 {strides = array<i32>} : memref<1x64x1024xf32, #tpu.memory_space<vmem>>, vector<1x64x1024xf32>,
    return
  }
  func.func @transform_0(%arg0: i32, %arg1: i32) -> (i32, i32, i32) {
    %c0_i32 = arith.constant 0 : i32
    %c0_i32_0 = arith.constant 0 : i32
    return %arg0, %c0_i32, %arg1 : i32, i32, i32
  }
  func.func @transform_1(%arg0: i32, %arg1: i32) -> (i32, i32, i32) {
    %c0_i32 = arith.constant 0 : i32
    %c0_i32_0 = arith.constant 0 : i32
    %c0_i32_1 = arith.constant 0 : i32
    return %arg0, %c0_i32, %c0_i32_0 : i32, i32, i32
  }
  func.func @transform_2(%arg0: i32, %arg1: i32) -> (i32, i32, i32) {
    %c0_i32 = arith.constant 0 : i32
    %c0_i32_0 = arith.constant 0 : i32
    return %arg0, %c0_i32, %arg1 : i32, i32, i32
  }
}

</mosaic_0001>

<bundles_post_ra>
// kernel: se_layer.3
= control target key start
LH: loop header
LB: loop body
LE: loop exit
PB: predicated region body
PF: predicated region fallthrough
CT: control target
= control target key end

     0   :  { %s669_s6 = smov 0   ;;  %s671_s7 = smov 0   ;;  %s991_s0 = inlined_call_operand.vmem [shape: f32[2,64,2048], index: 0, kind: input, shape index: {}]   ;;  %s992_s1 = inlined_call_operand.vmem [shape: f32[2,64,1], index: 1, kind: output, shape index: {}]  }
   0x1   :  { %s673_s8 = smov 0   ;;  %s675_s9 = smov 0  }
   0x2   :  { %s677_s10 = smov 0   ;;  %s679_s11 = smov 0  }
   0x3   :  { %s681_s12 = smov 0  }
   0x4 LB: > { %s20_s13 = sadd.s32 1, %s648_s10  ;;  %s23_s14 = sadd.s32 1, %s652_s11  ;;  %s656_s12 = sphi %s681_s12, %s11_s12   ;;  %s652_s11 = sphi %s679_s11, %s998_s11   ;;  %s648_s10 = sphi %s677_s10, %s997_s10   ;;  %s644_s9 = sphi %s675_s9, %s996_s9   ;;  %s640_s8 = sphi %s673_s8, %s995_s8   ;;  %s636_s7 = sphi %s671_s7, %s994_s7   ;;  %s632_s6 = sphi %s669_s6, %s993_s6  }
   0x5   : > { %p21_p0 = scmp.ge.s32.totalorder %s20_s13, 2  ;;  %p39_p1 = scmp.ne.s32.totalorder %s636_s7, %s632_s6 }
   0x6   : > { %p40_p2 = scmp.eq.s32.totalorder %s656_s12, 0  ;;  %s32_s18 = sadd.s32 1, %s636_s7 }
   0x7   : > { %s1000_s13 = smov (%p21_p0, %s20_s13), 0  ;;  %s1002_s14 = smov (!%p21_p0, %s23_s14), %s652_s11 }
   0x8   : > { %p41_p3 = por %p40_p2, %p39_p1  ;;  %p25_p4 = scmp.ge.s32.totalorder %s1002_s14, 2 }
   0x9   : > { %s28_s15 = ssub.s32 %s648_s10, %s1000_s13  ;;  %p532_p6 = scmp.ge.s32.totalorder %s656_s12, 4 }
   0xa   : > { %s1004_s14 = smov (%p25_p4, %s1002_s14), 0 }
   0xb   : > { %s27_s16 = ssub.s32 %s652_s11, %s1004_s14  ;;  %91 = sbr.rel (%p532_p6) target bundleno = 87 (0x57), region = 16 }
   0xc   : > { %s29_s17 = sor.u32 %s28_s15, %s27_s16 }
   0xd   : > { %p30_p5 = scmp.eq.s32.totalorder %s29_s17, 0 }
   0xf   : > { %s720_s19 = scalar_select %p30_p5, %s636_s7, %s32_s18  }
  0x10   : > { %94 = sbr.rel (!%p41_p3) target bundleno = 87 (0x57), region = 20  ;;  %s96_s20 = sand.u32 (%p41_p3), 1, %s636_s7  }
  0x11   : > { %s534_s21 = sshll.u32 (%p41_p3), %s648_s10, 3  ;;  %s533_s22 = sshll.u32 (%p41_p3), %s96_s20, 9 }
  0x12   : > { %s535_s23 = sshll.u32 (%p41_p3), %s652_s11, 7  ;;  %s734_s29 = scalar_lea.vmem (%p41_p3), [#allocation2], %s533_s22 }
  0x13   : > { %s101_s24 = sadd.s32 (%p41_p3), %s535_s23, %s534_s21 }
  0x14   : > { %s536_s25 = sshll.u32 (%p41_p3), %s101_s24, 3 }
  0x15   : > { %s729_s28 = scalar_lea.vmem %s991_s0, %s536_s25 }
  0x16   : > { %v116_v0 = vld [vmem:[%s729_s28] sm:$0xff]  ;;  %v118_v1 = vld [vmem:[%s729_s28 + $0x8] sm:$0xff]  ;;  %v120_v2 = vld [vmem:[%s729_s28 + $0x10] sm:$0xff] }
  0x17   : > { %117 = vst [vmem:[%s734_s29] sm:$0xff] %v116_v0  ;;  %v122_v3 = vld [vmem:[%s729_s28 + $0x18] sm:$0xff]  ;;  %v124_v4 = vld [vmem:[%s729_s28 + $0x20] sm:$0xff]  ;;  %v126_v5 = vld [vmem:[%s729_s28 + $0x28] sm:$0xff] }
  0x18   : > { %119 = vst [vmem:[%s734_s29 + $0x8] sm:$0xff] %v118_v1  ;;  %v128_v6 = vld [vmem:[%s729_s28 + $0x30] sm:$0xff]  ;;  %v130_v7 = vld [vmem:[%s729_s28 + $0x38] sm:$0xff]  ;;  %v132_v8 = vld [vmem:[%s729_s28 + $0x80] sm:$0xff] }
  0x19   : > { %121 = vst [vmem:[%s734_s29 + $0x10] sm:$0xff] %v120_v2  ;;  %v134_v9 = vld [vmem:[%s729_s28 + $0x88] sm:$0xff]  ;;  %v136_v10 = vld [vmem:[%s729_s28 + $0x90] sm:$0xff]  ;;  %v138_v11 = vld [vmem:[%s729_s28 + $0x98] sm:$0xff] }
  0x1a   : > { %123 = vst [vmem:[%s734_s29 + $0x18] sm:$0xff] %v122_v3  ;;  %v140_v12 = vld [vmem:[%s729_s28 + $0xa0] sm:$0xff]  ;;  %v142_v13 = vld [vmem:[%s729_s28 + $0xa8] sm:$0xff]  ;;  %v144_v14 = vld [vmem:[%s729_s28 + $0xb0] sm:$0xff] }
  0x1b   : > { %125 = vst [vmem:[%s734_s29 + $0x20] sm:$0xff] %v124_v4  ;;  %v146_v15 = vld [vmem:[%s729_s28 + $0xb8] sm:$0xff]  ;;  %v148_v16 = vld [vmem:[%s729_s28 + $0x100] sm:$0xff]  ;;  %v150_v17 = vld [vmem:[%s729_s28 + $0x108] sm:$0xff] }
  0x1c   : > { %127 = vst [vmem:[%s734_s29 + $0x28] sm:$0xff] %v126_v5  ;;  %v152_v18 = vld [vmem:[%s729_s28 + $0x110] sm:$0xff]  ;;  %v154_v19 = vld [vmem:[%s729_s28 + $0x118] sm:$0xff]  ;;  %v156_v20 = vld [vmem:[%s729_s28 + $0x120] sm:$0xff] }
  0x1d   : > { %129 = vst [vmem:[%s734_s29 + $0x30] sm:$0xff] %v128_v6  ;;  %v158_v21 = vld [vmem:[%s729_s28 + $0x128] sm:$0xff]  ;;  %v160_v22 = vld [vmem:[%s729_s28 + $0x130] sm:$0xff]  ;;  %v162_v23 = vld [vmem:[%s729_s28 + $0x138] sm:$0xff] }
  0x1e   : > { %131 = vst [vmem:[%s734_s29 + $0x38] sm:$0xff] %v130_v7  ;;  %v164_v24 = vld [vmem:[%s729_s28 + $0x180] sm:$0xff]  ;;  %v166_v25 = vld [vmem:[%s729_s28 + $0x188] sm:$0xff]  ;;  %v168_v26 = vld [vmem:[%s729_s28 + $0x190] sm:$0xff] }
  0x1f   : > { %133 = vst [vmem:[%s734_s29 + $0x40] sm:$0xff] %v132_v8  ;;  %v170_v27 = vld [vmem:[%s729_s28 + $0x198] sm:$0xff]  ;;  %v172_v28 = vld [vmem:[%s729_s28 + $0x1a0] sm:$0xff]  ;;  %v174_v29 = vld [vmem:[%s729_s28 + $0x1a8] sm:$0xff] }
  0x20   : > { %135 = vst [vmem:[%s734_s29 + $0x48] sm:$0xff] %v134_v9  ;;  %v176_v30 = vld [vmem:[%s729_s28 + $0x1b0] sm:$0xff]  ;;  %v178_v31 = vld [vmem:[%s729_s28 + $0x1b8] sm:$0xff]  ;;  %v180_v32 = vld [vmem:[%s729_s28 + $0x200] sm:$0xff] }
  0x21   : > { %137 = vst [vmem:[%s734_s29 + $0x50] sm:$0xff] %v136_v10  ;;  %v182_v33 = vld [vmem:[%s729_s28 + $0x208] sm:$0xff]  ;;  %v184_v34 = vld [vmem:[%s729_s28 + $0x210] sm:$0xff]  ;;  %v186_v35 = vld [vmem:[%s729_s28 + $0x218] sm:$0xff] }
  0x22   : > { %139 = vst [vmem:[%s734_s29 + $0x58] sm:$0xff] %v138_v11  ;;  %v188_v36 = vld [vmem:[%s729_s28 + $0x220] sm:$0xff]  ;;  %v190_v37 = vld [vmem:[%s729_s28 + $0x228] sm:$0xff]  ;;  %v192_v38 = vld [vmem:[%s729_s28 + $0x230] sm:$0xff] }
  0x23   : > { %141 = vst [vmem:[%s734_s29 + $0x60] sm:$0xff] %v140_v12  ;;  %v194_v39 = vld [vmem:[%s729_s28 + $0x238] sm:$0xff]  ;;  %v196_v40 = vld [vmem:[%s729_s28 + $0x280] sm:$0xff]  ;;  %v198_v41 = vld [vmem:[%s729_s28 + $0x288] sm:$0xff] }
  0x24   : > { %143 = vst [vmem:[%s734_s29 + $0x68] sm:$0xff] %v142_v13  ;;  %v200_v42 = vld [vmem:[%s729_s28 + $0x290] sm:$0xff]  ;;  %v202_v43 = vld [vmem:[%s729_s28 + $0x298] sm:$0xff]  ;;  %v204_v44 = vld [vmem:[%s729_s28 + $0x2a0] sm:$0xff] }
  0x25   : > { %145 = vst [vmem:[%s734_s29 + $0x70] sm:$0xff] %v144_v14  ;;  %v206_v45 = vld [vmem:[%s729_s28 + $0x2a8] sm:$0xff]  ;;  %v208_v46 = vld [vmem:[%s729_s28 + $0x2b0] sm:$0xff]  ;;  %v210_v47 = vld [vmem:[%s729_s28 + $0x2b8] sm:$0xff] }
  0x26   : > { %147 = vst [vmem:[%s734_s29 + $0x78] sm:$0xff] %v146_v15  ;;  %v212_v48 = vld [vmem:[%s729_s28 + $0x300] sm:$0xff]  ;;  %v214_v49 = vld [vmem:[%s729_s28 + $0x308] sm:$0xff]  ;;  %v216_v50 = vld [vmem:[%s729_s28 + $0x310] sm:$0xff] }
  0x27   : > { %149 = vst [vmem:[%s734_s29 + $0x80] sm:$0xff] %v148_v16  ;;  %v218_v51 = vld [vmem:[%s729_s28 + $0x318] sm:$0xff]  ;;  %v220_v52 = vld [vmem:[%s729_s28 + $0x320] sm:$0xff]  ;;  %v222_v53 = vld [vmem:[%s729_s28 + $0x328] sm:$0xff] }
  0x28   : > { %151 = vst [vmem:[%s734_s29 + $0x88] sm:$0xff] %v150_v17  ;;  %v224_v54 = vld [vmem:[%s729_s28 + $0x330] sm:$0xff]  ;;  %v226_v55 = vld [vmem:[%s729_s28 + $0x338] sm:$0xff]  ;;  %v228_v56 = vld [vmem:[%s729_s28 + $0x380] sm:$0xff] }
  0x29   : > { %153 = vst [vmem:[%s734_s29 + $0x90] sm:$0xff] %v152_v18  ;;  %v230_v57 = vld [vmem:[%s729_s28 + $0x388] sm:$0xff]  ;;  %v232_v58 = vld [vmem:[%s729_s28 + $0x390] sm:$0xff]  ;;  %v234_v59 = vld [vmem:[%s729_s28 + $0x398] sm:$0xff] }
  0x2a   : > { %155 = vst [vmem:[%s734_s29 + $0x98] sm:$0xff] %v154_v19  ;;  %v236_v60 = vld [vmem:[%s729_s28 + $0x3a0] sm:$0xff]  ;;  %v238_v61 = vld [vmem:[%s729_s28 + $0x3a8] sm:$0xff]  ;;  %v240_v62 = vld [vmem:[%s729_s28 + $0x3b0] sm:$0xff] }
  0x2b   : > { %157 = vst [vmem:[%s734_s29 + $0xa0] sm:$0xff] %v156_v20  ;;  %v242_v63 = vld [vmem:[%s729_s28 + $0x3b8] sm:$0xff] }
  0x2c   : > { %159 = vst [vmem:[%s734_s29 + $0xa8] sm:$0xff] %v158_v21 }
  0x2d   : > { %161 = vst [vmem:[%s734_s29 + $0xb0] sm:$0xff] %v160_v22 }
  0x2e   : > { %163 = vst [vmem:[%s734_s29 + $0xb8] sm:$0xff] %v162_v23 }
  0x2f   : > { %165 = vst [vmem:[%s734_s29 + $0xc0] sm:$0xff] %v164_v24 }
  0x30   : > { %167 = vst [vmem:[%s734_s29 + $0xc8] sm:$0xff] %v166_v25 }
  0x31   : > { %169 = vst [vmem:[%s734_s29 + $0xd0] sm:$0xff] %v168_v26 }
  0x32   : > { %171 = vst [vmem:[%s734_s29 + $0xd8] sm:$0xff] %v170_v27 }
  0x33   : > { %173 = vst [vmem:[%s734_s29 + $0xe0] sm:$0xff] %v172_v28 }
  0x34   : > { %175 = vst [vmem:[%s734_s29 + $0xe8] sm:$0xff] %v174_v29 }
  0x35   : > { %177 = vst [vmem:[%s734_s29 + $0xf0] sm:$0xff] %v176_v30 }
  0x36   : > { %179 = vst [vmem:[%s734_s29 + $0xf8] sm:$0xff] %v178_v31 }
  0x37   : > { %181 = vst [vmem:[%s734_s29 + $0x100] sm:$0xff] %v180_v32 }
  0x38   : > { %183 = vst [vmem:[%s734_s29 + $0x108] sm:$0xff] %v182_v33 }
  0x39   : > { %185 = vst [vmem:[%s734_s29 + $0x110] sm:$0xff] %v184_v34 }
  0x3a   : > { %187 = vst [vmem:[%s734_s29 + $0x118] sm:$0xff] %v186_v35 }
  0x3b   : > { %189 = vst [vmem:[%s734_s29 + $0x120] sm:$0xff] %v188_v36 }
  0x3c   : > { %191 = vst [vmem:[%s734_s29 + $0x128] sm:$0xff] %v190_v37 }
  0x3d   : > { %193 = vst [vmem:[%s734_s29 + $0x130] sm:$0xff] %v192_v38 }
  0x3e   : > { %195 = vst [vmem:[%s734_s29 + $0x138] sm:$0xff] %v194_v39 }
  0x3f   : > { %197 = vst [vmem:[%s734_s29 + $0x140] sm:$0xff] %v196_v40 }
  0x40   : > { %199 = vst [vmem:[%s734_s29 + $0x148] sm:$0xff] %v198_v41 }
  0x41   : > { %201 = vst [vmem:[%s734_s29 + $0x150] sm:$0xff] %v200_v42 }
  0x42   : > { %203 = vst [vmem:[%s734_s29 + $0x158] sm:$0xff] %v202_v43 }
  0x43   : > { %205 = vst [vmem:[%s734_s29 + $0x160] sm:$0xff] %v204_v44 }
  0x44   : > { %207 = vst [vmem:[%s734_s29 + $0x168] sm:$0xff] %v206_v45 }
  0x45   : > { %209 = vst [vmem:[%s734_s29 + $0x170] sm:$0xff] %v208_v46 }
  0x46   : > { %211 = vst [vmem:[%s734_s29 + $0x178] sm:$0xff] %v210_v47 }
  0x47   : > { %213 = vst [vmem:[%s734_s29 + $0x180] sm:$0xff] %v212_v48 }
  0x48   : > { %215 = vst [vmem:[%s734_s29 + $0x188] sm:$0xff] %v214_v49 }
  0x49   : > { %217 = vst [vmem:[%s734_s29 + $0x190] sm:$0xff] %v216_v50 }
  0x4a   : > { %219 = vst [vmem:[%s734_s29 + $0x198] sm:$0xff] %v218_v51 }
  0x4b   : > { %221 = vst [vmem:[%s734_s29 + $0x1a0] sm:$0xff] %v220_v52 }
  0x4c   : > { %223 = vst [vmem:[%s734_s29 + $0x1a8] sm:$0xff] %v222_v53 }
  0x4d   : > { %225 = vst [vmem:[%s734_s29 + $0x1b0] sm:$0xff] %v224_v54 }
  0x4e   : > { %227 = vst [vmem:[%s734_s29 + $0x1b8] sm:$0xff] %v226_v55 }
  0x4f   : > { %229 = vst [vmem:[%s734_s29 + $0x1c0] sm:$0xff] %v228_v56 }
  0x50   : > { %231 = vst [vmem:[%s734_s29 + $0x1c8] sm:$0xff] %v230_v57 }
  0x51   : > { %233 = vst [vmem:[%s734_s29 + $0x1d0] sm:$0xff] %v232_v58 }
  0x52   : > { %235 = vst [vmem:[%s734_s29 + $0x1d8] sm:$0xff] %v234_v59 }
  0x53   : > { %237 = vst [vmem:[%s734_s29 + $0x1e0] sm:$0xff] %v236_v60 }
  0x54   : > { %239 = vst [vmem:[%s734_s29 + $0x1e8] sm:$0xff] %v238_v61 }
  0x55   : > { %241 = vst [vmem:[%s734_s29 + $0x1f0] sm:$0xff] %v240_v62 }
  0x56   : > { %243 = vst [vmem:[%s734_s29 + $0x1f8] sm:$0xff] %v242_v63 }
  0x57 PF: > { %p537_p7 = scmp.ge.s32.totalorder %s656_s12, 1  ;;  %p248_p8 = scmp.lt.s32.totalorder %s656_s12, 5 }
  0x59   : > { %p249_p9 = pnand %p537_p7, %p248_p8 }
  0x5a   : > { %s255_s30 = sand.u32 (!%p249_p9), 1, %s632_s6   ;;  %p275_p10 = scmp.lt.s32.totalorder (!%p249_p9), %s644_s9, 1 }
  0x5b   : > { %252 = sbr.rel (%p249_p9) target bundleno = 261 (0x105), region = 43  ;;  %s538_s2 = sshll.u32 (!%p249_p9), %s255_s30, 9 }
  0x5c   : > { %s871_s16 = scalar_lea.vmem (!%p249_p9), [#allocation2], %s538_s2  ;;  %p541_p11 = scmp.ne.s32.totalorder (!%p249_p9), %s640_s8, 0 }
  0x60   : > { %s1006_s9 = smov (!%p275_p10, %s644_s9), 1  ;;  %283 = sbr.rel (%p541_p11) target bundleno = 110 (0x6e), region = 51 }
  0x61   : > { %s544_s3 = sshll.u32 %s1006_s9, 6 }
  0x62   : > { %s869_s15 = scalar_lea.vmem %s992_s1, %s544_s3 }
  0x65   : > { %vm284_vm0 = vcmask 7168   ;;  %v658_v0 = vmov 0.0  }
  0x66   : > { %285 = vst.msk [vmem:[%s869_s15] sm:$0xff] %vm284_vm0, %v658_v0 }
  0x67   : > { %286 = vst.msk [vmem:[%s869_s15 + $0x8] sm:$0xff] %vm284_vm0, %v658_v0 }
  0x68   : > { %287 = vst.msk [vmem:[%s869_s15 + $0x10] sm:$0xff] %vm284_vm0, %v658_v0 }
  0x69   : > { %288 = vst.msk [vmem:[%s869_s15 + $0x18] sm:$0xff] %vm284_vm0, %v658_v0 }
  0x6a   : > { %289 = vst.msk [vmem:[%s869_s15 + $0x20] sm:$0xff] %vm284_vm0, %v658_v0 }
  0x6b   : > { %290 = vst.msk [vmem:[%s869_s15 + $0x28] sm:$0xff] %vm284_vm0, %v658_v0 }
  0x6c   : > { %291 = vst.msk [vmem:[%s869_s15 + $0x30] sm:$0xff] %vm284_vm0, %v658_v0 }
  0x6d   : > { %292 = vst.msk [vmem:[%s869_s15 + $0x38] sm:$0xff] %vm284_vm0, %v658_v0 }
  0x6e PF: > { %v317_v1 = vld [vmem:[%s871_s16 + $0x80] sm:$0xff]  ;;  %v318_v2 = vld [vmem:[%s871_s16 + $0x88] sm:$0xff]  ;;  %v319_v3 = vld [vmem:[%s871_s16 + $0x90] sm:$0xff]  ;;  %vm445_vm1 = vcmask 7168  }
  0x6f   : > { %v383_v4 = vadd.f32 %v318_v2, %v317_v1  ;;  %v320_v5 = vld [vmem:[%s871_s16 + $0x98] sm:$0xff]  ;;  %v301_v6 = vld [vmem:[%s871_s16] sm:$0xff]  ;;  %v302_v8 = vld [vmem:[%s871_s16 + $0x8] sm:$0xff] }
  0x70   : > { %v303_v9 = vld [vmem:[%s871_s16 + $0x10] sm:$0xff]  ;;  %v321_v10 = vld [vmem:[%s871_s16 + $0xa0] sm:$0xff]  ;;  %v365_v11 = vadd.f32 %v302_v8, %v301_v6  ;;  %v304_v13 = vld [vmem:[%s871_s16 + $0x18] sm:$0xff] }
  0x71   : > { %v384_v7 = vadd.f32 %v383_v4, %v319_v3  ;;  %v333_v14 = vld [vmem:[%s871_s16 + $0x100] sm:$0xff]  ;;  %v334_v15 = vld [vmem:[%s871_s16 + $0x108] sm:$0xff]  ;;  %v335_v18 = vld [vmem:[%s871_s16 + $0x110] sm:$0xff] }
  0x72   : > { %v322_v16 = vld [vmem:[%s871_s16 + $0xa8] sm:$0xff]  ;;  %v366_v17 = vadd.f32 %v365_v11, %v303_v9  ;;  %v401_v19 = vadd.f32 %v334_v15, %v333_v14  ;;  %v323_v20 = vld [vmem:[%s871_s16 + $0xb0] sm:$0xff]  ;;  %v305_v22 = vld [vmem:[%s871_s16 + $0x20] sm:$0xff] }
  0x73   : > { %v385_v12 = vadd.f32 %v384_v7, %v320_v5  ;;  %v336_v23 = vld [vmem:[%s871_s16 + $0x118] sm:$0xff]  ;;  %v325_v26 = vld [vmem:[%s871_s16 + $0xc0] sm:$0xff]  ;;  %v326_v27 = vld [vmem:[%s871_s16 + $0xc8] sm:$0xff] }
  0x74   : > { %v367_v24 = vadd.f32 %v366_v17, %v304_v13  ;;  %v402_v25 = vadd.f32 %v401_v19, %v335_v18  ;;  %v327_v28 = vld [vmem:[%s871_s16 + $0xd0] sm:$0xff]  ;;  %v324_v29 = vld [vmem:[%s871_s16 + $0xb8] sm:$0xff]  ;;  %v306_v31 = vld [vmem:[%s871_s16 + $0x28] sm:$0xff]  ;;  %v392_v33 = vadd.f32 %v326_v27, %v325_v26 }
  0x75   : > { %v386_v21 = vadd.f32 %v385_v12, %v321_v10  ;;  %v337_v32 = vld [vmem:[%s871_s16 + $0x120] sm:$0xff]  ;;  %v307_v34 = vld [vmem:[%s871_s16 + $0x30] sm:$0xff]  ;;  %v328_v37 = vld [vmem:[%s871_s16 + $0xd8] sm:$0xff] }
  0x76   : > { %v368_v35 = vadd.f32 %v367_v24, %v305_v22  ;;  %v403_v36 = vadd.f32 %v402_v25, %v336_v23  ;;  %v309_v38 = vld [vmem:[%s871_s16 + $0x40] sm:$0xff]  ;;  %v338_v40 = vld [vmem:[%s871_s16 + $0x128] sm:$0xff]  ;;  %v393_v41 = vadd.f32 %v392_v33, %v327_v28  ;;  %v311_v43 = vld [vmem:[%s871_s16 + $0x50] sm:$0xff] }
  0x77   : > { %v387_v30 = vadd.f32 %v386_v21, %v322_v16  ;;  %v310_v42 = vld [vmem:[%s871_s16 + $0x48] sm:$0xff]  ;;  %v308_v44 = vld [vmem:[%s871_s16 + $0x38] sm:$0xff]  ;;  %v339_v46 = vld [vmem:[%s871_s16 + $0x130] sm:$0xff] }
  0x78   : > { %v369_v45 = vadd.f32 %v368_v35, %v306_v31  ;;  %v404_v47 = vadd.f32 %v403_v36, %v337_v32  ;;  %v329_v48 = vld [vmem:[%s871_s16 + $0xe0] sm:$0xff]  ;;  %v374_v49 = vadd.f32 %v310_v42, %v309_v38  ;;  %v394_v51 = vadd.f32 %v393_v41, %v328_v37  ;;  %v312_v52 = vld [vmem:[%s871_s16 + $0x58] sm:$0xff]  ;;  %v342_v54 = vld [vmem:[%s871_s16 + $0x148] sm:$0xff] }
  0x79   : > { %v388_v39 = vadd.f32 %v387_v30, %v323_v20  ;;  %v341_v53 = vld [vmem:[%s871_s16 + $0x140] sm:$0xff]  ;;  %v340_v56 = vld [vmem:[%s871_s16 + $0x138] sm:$0xff]  ;;  %v330_v58 = vld [vmem:[%s871_s16 + $0xe8] sm:$0xff] }
  0x7a   : > { %v370_v55 = vadd.f32 %v369_v45, %v307_v34  ;;  %v405_v57 = vadd.f32 %v404_v47, %v338_v40  ;;  %v375_v59 = vadd.f32 %v374_v49, %v311_v43  ;;  %v343_v60 = vld [vmem:[%s871_s16 + $0x150] sm:$0xff]  ;;  %v410_v61 = vadd.f32 %v342_v54, %v341_v53  ;;  %v313_v0 = vld [vmem:[%s871_s16 + $0x60] sm:$0xff]  ;;  %v344_v1 = vld [vmem:[%s871_s16 + $0x158] sm:$0xff] }
  0x7b   : > { %v389_v50 = vadd.f32 %v388_v39, %v324_v29  ;;  %v331_v62 = vld [vmem:[%s871_s16 + $0xf0] sm:$0xff]  ;;  %v395_v63 = vadd.f32 %v394_v51, %v329_v48  ;;  %v357_v6 = vld [vmem:[%s871_s16 + $0x1c0] sm:$0xff]  ;;  %v358_v7 = vld [vmem:[%s871_s16 + $0x1c8] sm:$0xff] }
  0x7c   : > { %v371_v2 = vadd.f32 %v370_v55, %v308_v44  ;;  %v406_v3 = vadd.f32 %v405_v57, %v339_v46  ;;  %v376_v4 = vadd.f32 %v375_v59, %v312_v52  ;;  %v411_v5 = vadd.f32 %v410_v61, %v343_v60  ;;  %v359_v8 = vld [vmem:[%s871_s16 + $0x1d0] sm:$0xff]  ;;  %v332_v9 = vld [vmem:[%s871_s16 + $0xf8] sm:$0xff]  ;;  %v314_v11 = vld [vmem:[%s871_s16 + $0x68] sm:$0xff] }
  0x7d   : > { %390 = vadd.xlane.f32.xlu1 %v389_v50  ;;  %v396_v10 = vadd.f32 %v395_v63, %v330_v58  ;;  %v345_v12 = vld [vmem:[%s871_s16 + $0x160] sm:$0xff]  ;;  %v428_v13 = vadd.f32 %v358_v7, %v357_v6  ;;  %v315_v15 = vld [vmem:[%s871_s16 + $0x70] sm:$0xff]  ;;  %v360_v18 = vld [vmem:[%s871_s16 + $0x1d8] sm:$0xff] }
  0x7e   : > { %372 = vadd.xlane.f32.xlu0 %v371_v2  ;;  %v407_v14 = vadd.f32 %v406_v3, %v340_v56  ;;  %v377_v16 = vadd.f32 %v376_v4, %v313_v0  ;;  %v412_v17 = vadd.f32 %v411_v5, %v344_v1  ;;  %v349_v19 = vld [vmem:[%s871_s16 + $0x180] sm:$0xff]  ;;  %v346_v21 = vld [vmem:[%s871_s16 + $0x168] sm:$0xff]  ;;  %v351_v24 = vld [vmem:[%s871_s16 + $0x190] sm:$0xff] }
  0x7f   : > { %v397_v20 = vadd.f32 %v396_v10, %v331_v62  ;;  %v429_v22 = vadd.f32 %v428_v13, %v359_v8  ;;  %v350_v23 = vld [vmem:[%s871_s16 + $0x188] sm:$0xff]  ;;  %v361_v27 = vld [vmem:[%s871_s16 + $0x1e0] sm:$0xff]  ;;  %v316_v30 = vld [vmem:[%s871_s16 + $0x78] sm:$0xff] }
  0x80   : > { %408 = vadd.xlane.f32.xlu2 %v407_v14  ;;  %v378_v25 = vadd.f32 %v377_v16, %v314_v11  ;;  %v413_v26 = vadd.f32 %v412_v17, %v345_v12  ;;  %v419_v28 = vadd.f32 %v350_v23, %v349_v19  ;;  %v347_v31 = vld [vmem:[%s871_s16 + $0x170] sm:$0xff]  ;;  %v352_v33 = vld [vmem:[%s871_s16 + $0x198] sm:$0xff]  ;;  %v362_v36 = vld [vmem:[%s871_s16 + $0x1e8] sm:$0xff] }
  0x81   : > { %v398_v29 = vadd.f32 %v397_v20, %v332_v9  ;;  %v430_v32 = vadd.f32 %v429_v22, %v360_v18  ;;  %v348_v38 = vld [vmem:[%s871_s16 + $0x178] sm:$0xff]  ;;  %v353_v40 = vld [vmem:[%s871_s16 + $0x1a0] sm:$0xff]  ;;  %v363_v43 = vld [vmem:[%s871_s16 + $0x1f0] sm:$0xff] }
  0x82   : > { %v379_v34 = vadd.f32 %v378_v25, %v315_v15  ;;  %v414_v35 = vadd.f32 %v413_v26, %v346_v21  ;;  %v420_v37 = vadd.f32 %v419_v28, %v351_v24  ;;  %v354_v46 = vld [vmem:[%s871_s16 + $0x1a8] sm:$0xff]  ;;  %v364_v48 = vld [vmem:[%s871_s16 + $0x1f8] sm:$0xff]  ;;  %v355_v51 = vld [vmem:[%s871_s16 + $0x1b0] sm:$0xff] }
  0x83   : > { %v431_v39 = vadd.f32 %v430_v32, %v361_v27  ;;  %v356_v54 = vld [vmem:[%s871_s16 + $0x1b8] sm:$0xff]  ;;  %v295_v57 = vld [vmem:[%s869_s15 + $0x10] sm:$0xff]  ;;  %v293_v60 = vld [vmem:[%s869_s15] sm:$0xff] }
  0x84   : > { %v380_v41 = vadd.f32 %v379_v34, %v316_v30  ;;  %v415_v42 = vadd.f32 %v414_v35, %v347_v31  ;;  %v421_v44 = vadd.f32 %v420_v37, %v352_v33  ;;  %v297_v62 = vld [vmem:[%s869_s15 + $0x20] sm:$0xff]  ;;  %v296_v2 = vld [vmem:[%s869_s15 + $0x18] sm:$0xff]  ;;  %v294_v5 = vld [vmem:[%s869_s15 + $0x8] sm:$0xff] }
  0x85   : > { %399 = vadd.xlane.f32.xlu1 %v398_v29  ;;  %v432_v45 = vadd.f32 %v431_v39, %v362_v36  ;;  %v298_v7 = vld [vmem:[%s869_s15 + $0x28] sm:$0xff]  ;;  %v300_v11 = vld [vmem:[%s869_s15 + $0x38] sm:$0xff]  ;;  %v299_v14 = vld [vmem:[%s869_s15 + $0x30] sm:$0xff] }
  0x86   : > { %381 = vadd.xlane.f32.xlu0 %v380_v41  ;;  %v416_v47 = vadd.f32 %v415_v42, %v348_v38  ;;  %v422_v49 = vadd.f32 %v421_v44, %v353_v40 }
  0x87   : > { %v433_v50 = vadd.f32 %v432_v45, %v363_v43 }
  0x88   : > { %417 = vadd.xlane.f32.xlu2 %v416_v47  ;;  %v423_v52 = vadd.f32 %v422_v49, %v354_v46 }
  0x89   : > { %v434_v53 = vadd.f32 %v433_v50, %v364_v48 }
  0x8a   : > { %v424_v55 = vadd.f32 %v423_v52, %v355_v51 }
  0x8c   : > { %v425_v56 = vadd.f32 %v424_v55, %v356_v54 }
  0x8d   : > { %435 = vadd.xlane.f32.xlu1 %v434_v53 }
  0x8e   : > { %426 = vadd.xlane.f32.xlu0 %v425_v56 }
  0xf0   : > { %v391_v58 = vpop.xlane.xlu1 %390 }
  0xf1   : > { %v439_v59 = vadd.f32 %v391_v58, %v295_v57  ;;  %v373_v61 = vpop.xlane.xlu0 %372 }
  0xf2   : > { %v437_v63 = vadd.f32 %v373_v61, %v293_v60 }
  0xf3   : > { %448 = vst.msk [vmem:[%s869_s15 + $0x10] sm:$0xff] %vm445_vm1, %v439_v59  ;;  %v409_v0 = vpop.xlane.xlu2 %408 }
  0xf4   : > { %446 = vst.msk [vmem:[%s869_s15] sm:$0xff] %vm445_vm1, %v437_v63  ;;  %v441_v1 = vadd.f32 %v409_v0, %v297_v62 }
  0xf6   : > { %450 = vst.msk [vmem:[%s869_s15 + $0x20] sm:$0xff] %vm445_vm1, %v441_v1 }
  0xf8   : > { %v400_v3 = vpop.xlane.xlu1 %399 }
  0xf9   : > { %v440_v4 = vadd.f32 %v400_v3, %v296_v2  ;;  %v382_v6 = vpop.xlane.xlu0 %381 }
  0xfa   : > { %v438_v8 = vadd.f32 %v382_v6, %v294_v5 }
  0xfb   : > { %449 = vst.msk [vmem:[%s869_s15 + $0x18] sm:$0xff] %vm445_vm1, %v440_v4  ;;  %v418_v9 = vpop.xlane.xlu2 %417 }
  0xfc   : > { %447 = vst.msk [vmem:[%s869_s15 + $0x8] sm:$0xff] %vm445_vm1, %v438_v8  ;;  %v442_v10 = vadd.f32 %v418_v9, %v298_v7 }
  0xfe   : > { %451 = vst.msk [vmem:[%s869_s15 + $0x28] sm:$0xff] %vm445_vm1, %v442_v10 }
 0x100   : > { %v436_v12 = vpop.xlane.xlu1 %435 }
 0x101   : > { %v444_v13 = vadd.f32 %v436_v12, %v300_v11  ;;  %v427_v15 = vpop.xlane.xlu0 %426 }
 0x102   : > { %v443_v16 = vadd.f32 %v427_v15, %v299_v14 }
 0x103   : > { %453 = vst.msk [vmem:[%s869_s15 + $0x38] sm:$0xff] %vm445_vm1, %v444_v13 }
 0x104   : > { %452 = vst.msk [vmem:[%s869_s15 + $0x30] sm:$0xff] %vm445_vm1, %v443_v16 }
 0x105 PF: > { %s11_s12 = sadd.s32 1, %s656_s12   ;;  %s993_s6 = smov %s636_s7 }
 0x106   : > { %p8_p12 = scmp.ge.s32.totalorder %s11_s12, 6   ;;  %s994_s7 = smov %s720_s19 }
 0x107   : > { %s995_s8 = smov %s648_s10  ;;  %s996_s9 = smov %s652_s11 }
 0x108   : > { %s997_s10 = smov %s1000_s13  ;;  %s998_s11 = smov %s1004_s14 }
 0x109   :  { %10 = sbr.rel (!%p8_p12) target bundleno = 4 (0x4), region = 86 }

// kernel: se_layer.4
= control target key start
LH: loop header
LB: loop body
LE: loop exit
PB: predicated region body
PF: predicated region fallthrough
CT: control target
= control target key end

     0   :  { %vm33_vm0 = vcmask 523264   ;;  %vm64_vm1 = vcmask 130048   ;;  %vm107_vm5 = vcmask 517120   ;;  %s193_s1 = inlined_call_operand.vmem [shape: f32[64,16], index: 1, kind: input, shape index: {}]   ;;  %s194_s2 = inlined_call_operand.vmem [shape: f32[1,16], index: 2, kind: input, shape index: {}]   ;;  %s195_s0 = inlined_call_operand.vmem [shape: f32[2,64], index: 0, kind: input, shape index: {}]   ;;  %s196_s4 = inlined_call_operand.vmem [shape: f32[1,64], index: 4, kind: input, shape index: {}]   ;;  %s197_s3 = inlined_call_operand.vmem [shape: f32[16,64], index: 3, kind: input, shape index: {}]   ;;  %s198_s5 = inlined_call_operand.vmem [shape: f32[2,64], index: 5, kind: output, shape index: {}]  }
   0x1   :  { %v28_v0 = vld [vmem:[%s193_s1 + $0x38] sm:$0xff]  ;;  %v27_v1 = vld [vmem:[%s193_s1 + $0x30] sm:$0xff]  ;;  %v26_v2 = vld [vmem:[%s193_s1 + $0x28] sm:$0xff] }
   0x2   :  { %45 = vmatpush.msra.mxu0 %v28_v0  ;;  %v25_v3 = vld [vmem:[%s193_s1 + $0x20] sm:$0xff]  ;;  %v24_v4 = vld [vmem:[%s193_s1 + $0x18] sm:$0xff]  ;;  %v23_v5 = vld [vmem:[%s193_s1 + $0x10] sm:$0xff] }
   0x3   :  { %v22_v6 = vld [vmem:[%s193_s1 + $0x8] sm:$0xff]  ;;  %v21_v7 = vld [vmem:[%s193_s1] sm:$0xff] }
   0x4   :  { %46 = vmatpush.msra.mxu0 %v27_v1  ;;  %v20_v8 = vld [vmem:[%s195_s0] sm:$0x3]  ;;  %v59_v9 = vld [vmem:[%s197_s3 + $0x8] sm:$0xff] }
   0x5   :  { %82 = vmatpush.msra.mxu1 %v59_v9  ;;  %v58_v10 = vld [vmem:[%s197_s3] sm:$0xff] }
   0x6   :  { %47 = vmatpush.msra.mxu0 %v26_v2  ;;  %v115_v11 = vld [vmem:[%s194_s2] ss:$0 sm:$0xff] }
   0x7   :  { %83 = vmatpush.msra.mxu1 %v58_v10  ;;  %v116_v15 = vld [vmem:[%s196_s4] ss:$0 sm:$0xff] }
   0x8   :  { %48 = vmatpush.msra.mxu0 %v25_v3 }
   0xa   :  { %49 = vmatpush.msra.mxu0 %v24_v4 }
   0xc   :  { %50 = vmatpush.msra.mxu0 %v23_v5 }
   0xe   :  { %51 = vmatpush.msra.mxu0 %v22_v6 }
  0x10   :  { %52 = vmatpush.msra.mxu0 %v21_v7 }
  0x11   :  { %113 = vmatmul.msk.f32.vlgmr.msra.gmra.mxu0 %vm33_vm0, %v20_v8 }
  0x8e   :  { %v54_v12 = vpop.f32.mrf.mxu0 }
  0x8f   :  { %v55_v13 = vadd.f32 %v115_v11, %v54_v12 }
  0x91   :  { %v57_v14 = vmax.f32 %v55_v13, 0.0 }
  0x93   :  { %114 = vmatmul.msk.f32.vlgmr.msra.gmra.mxu1 %vm64_vm1, %v57_v14 }
 0x110   :  { %v85_v16 = vpop.f32.mrf.mxu1 }
 0x111   :  { %v86_v17 = vadd.f32 %v116_v15, %v85_v16 }
 0x113   :  { %v88_v18 = vsub.f32 0.0, %v86_v17 }
 0x115   :  { %v89_v19 = vmul.f32 1.442695, %v88_v18 }
 0x117   :  { %117 = vpow2.f32 %v89_v19 }
 0x11d   :  { %v118_v20 = vpop.eup %117 }
 0x11e   :  { %v91_v21 = vadd.f32 1.0, %v118_v20 }
 0x120   :  { %119 = vrcp.f32 %v91_v21  ;;  %v103_v25 = vand.u32 2147483648, %v91_v21  ;;  %v101_v27 = vand.u32 2147483647, %v91_v21  ;;  %vm97_vm3 = vweird.f32 %v91_v21 }
 0x122   :  { %v104_v29 = vor.u32 1.1754944e-38, %v103_v25  ;;  %vm102_vm6 = vcmp.eq.f32.partialorder %v101_v27, 8.507059e+37 }
 0x126   :  { %v120_v22 = vpop.eup %119 }
 0x127   :  { %v93_v23 = vmul.f32 %v120_v22, %v91_v21  ;;  %vm98_vm2 = vweird.f32 %v120_v22 }
 0x128   :  { %vm99_vm4 = vmor %vm97_vm3, %vm98_vm2 }
 0x129   :  { %v94_v24 = vsub.f32 1.0, %v93_v23 }
 0x12b   :  { %v95_v26 = vmul.f32 %v120_v22, %v94_v24 }
 0x12d   :  { %v96_v28 = vadd.f32 %v120_v22, %v95_v26 }
 0x12f   :  { %v100_v30 = vsel %vm99_vm4, %v120_v22, %v96_v28 }
 0x130   :  { %v105_v31 = vsel %vm102_vm6, %v104_v29, %v100_v30 }
 0x131   :  { %108 = vst.msk [vmem:[%s198_s5] sm:$0x3] %vm107_vm5, %v105_v31 }

// kernel: se_layer.5
= control target key start
LH: loop header
LB: loop body
LE: loop exit
PB: predicated region body
PF: predicated region fallthrough
CT: control target
= control target key end

     0   :  { %s957_s9 = smov 0   ;;  %s959_s10 = smov 0   ;;  %s1452_s0 = inlined_call_operand.vmem [shape: f32[2,64,2048], index: 0, kind: input, shape index: {}]   ;;  %s1453_s1 = inlined_call_operand.vmem [shape: f32[2,64,1], index: 1, kind: input, shape index: {}]   ;;  %s1454_s2 = inlined_call_operand.vmem [shape: f32[2,64,2048], index: 2, kind: output, shape index: {}]  }
   0x1   :  { %s961_s11 = smov 0   ;;  %s963_s12 = smov 0  }
   0x2   :  { %s965_s13 = smov 0   ;;  %s967_s14 = smov 0  }
   0x3   :  { %s969_s15 = smov 0  }
   0x4 LB: > { %s21_s16 = sadd.s32 1, %s931_s13  ;;  %s24_s17 = sadd.s32 1, %s935_s14  ;;  %s939_s15 = sphi %s969_s15, %s12_s15   ;;  %s935_s14 = sphi %s967_s14, %s1461_s14   ;;  %s931_s13 = sphi %s965_s13, %s1460_s13   ;;  %s927_s12 = sphi %s963_s12, %s1459_s12   ;;  %s923_s11 = sphi %s961_s11, %s1458_s11   ;;  %s919_s10 = sphi %s959_s10, %s1457_s10   ;;  %s915_s9 = sphi %s957_s9, %s1456_s9  }
   0x5   : > { %p22_p0 = scmp.ge.s32.totalorder %s21_s16, 2  ;;  %s805_s18 = sadd.s32 4294967295, %s939_s15  }
   0x6   : > { %p40_p1 = scmp.ne.s32.totalorder %s919_s10, %s915_s9  ;;  %p41_p2 = scmp.eq.s32.totalorder %s939_s15, 0 }
   0x7   : > { %s1463_s16 = smov (%p22_p0, %s21_s16), 0  ;;  %s1465_s17 = smov (!%p22_p0, %s24_s17), %s935_s14 }
   0x8   : > { %p26_p3 = scmp.ge.s32.totalorder %s1465_s17, 2  ;;  %p98_p4 = scmp.eq.s32.totalorder %s805_s18, 3 }
   0x9   : > { %s29_s19 = ssub.s32 %s931_s13, %s1463_s16  ;;  %p42_p5 = por %p41_p2, %p40_p1 }
   0xa   : > { %s1467_s17 = smov (%p26_p3, %s1465_s17), 0  ;;  %p1005_p6 = por %p98_p4, %p40_p1 }
   0xb   : > { %s28_s21 = ssub.s32 %s935_s14, %s1467_s17  ;;  %s33_s23 = sadd.s32 1, %s919_s10 }
   0xc   : > { %s30_s22 = sor.u32 %s29_s19, %s28_s21  ;;  %p808_p8 = scmp.ge.s32.totalorder %s939_s15, 4 }
   0xd   : > { %p31_p7 = scmp.eq.s32.totalorder %s30_s22, 0 }
   0xe   : > { %120 = sbr.rel (%p808_p8) target bundleno = 90 (0x5a), region = 16 }
   0xf   : > { %s1013_s24 = scalar_select %p31_p7, %s919_s10, %s33_s23  }
  0x13   : > { %123 = sbr.rel (!%p42_p5) target bundleno = 90 (0x5a), region = 20  ;;  %s125_s25 = sand.u32 (%p42_p5), 1, %s919_s10  }
  0x14   : > { %s810_s26 = sshll.u32 (%p42_p5), %s931_s13, 3  ;;  %s809_s27 = sshll.u32 (%p42_p5), %s125_s25, 9 }
  0x15   : > { %s811_s28 = sshll.u32 (%p42_p5), %s935_s14, 7  ;;  %s1027_s6 = scalar_lea.vmem (%p42_p5), [#allocation2], %s809_s27 }
  0x16   : > { %s130_s29 = sadd.s32 (%p42_p5), %s811_s28, %s810_s26 }
  0x17   : > { %s812_s30 = sshll.u32 (%p42_p5), %s130_s29, 3 }
  0x18   : > { %s1022_s5 = scalar_lea.vmem %s1452_s0, %s812_s30 }
  0x19   : > { %v145_v0 = vld [vmem:[%s1022_s5] sm:$0xff]  ;;  %v147_v1 = vld [vmem:[%s1022_s5 + $0x8] sm:$0xff]  ;;  %v149_v2 = vld [vmem:[%s1022_s5 + $0x10] sm:$0xff] }
  0x1a   : > { %146 = vst [vmem:[%s1027_s6] sm:$0xff] %v145_v0  ;;  %v151_v3 = vld [vmem:[%s1022_s5 + $0x18] sm:$0xff]  ;;  %v153_v4 = vld [vmem:[%s1022_s5 + $0x20] sm:$0xff]  ;;  %v155_v5 = vld [vmem:[%s1022_s5 + $0x28] sm:$0xff] }
  0x1b   : > { %148 = vst [vmem:[%s1027_s6 + $0x8] sm:$0xff] %v147_v1  ;;  %v157_v6 = vld [vmem:[%s1022_s5 + $0x30] sm:$0xff]  ;;  %v159_v7 = vld [vmem:[%s1022_s5 + $0x38] sm:$0xff]  ;;  %v161_v8 = vld [vmem:[%s1022_s5 + $0x80] sm:$0xff] }
  0x1c   : > { %150 = vst [vmem:[%s1027_s6 + $0x10] sm:$0xff] %v149_v2  ;;  %v163_v9 = vld [vmem:[%s1022_s5 + $0x88] sm:$0xff]  ;;  %v165_v10 = vld [vmem:[%s1022_s5 + $0x90] sm:$0xff]  ;;  %v167_v11 = vld [vmem:[%s1022_s5 + $0x98] sm:$0xff] }
  0x1d   : > { %152 = vst [vmem:[%s1027_s6 + $0x18] sm:$0xff] %v151_v3  ;;  %v169_v12 = vld [vmem:[%s1022_s5 + $0xa0] sm:$0xff]  ;;  %v171_v13 = vld [vmem:[%s1022_s5 + $0xa8] sm:$0xff]  ;;  %v173_v14 = vld [vmem:[%s1022_s5 + $0xb0] sm:$0xff] }
  0x1e   : > { %154 = vst [vmem:[%s1027_s6 + $0x20] sm:$0xff] %v153_v4  ;;  %v175_v15 = vld [vmem:[%s1022_s5 + $0xb8] sm:$0xff]  ;;  %v177_v16 = vld [vmem:[%s1022_s5 + $0x100] sm:$0xff]  ;;  %v179_v17 = vld [vmem:[%s1022_s5 + $0x108] sm:$0xff] }
  0x1f   : > { %156 = vst [vmem:[%s1027_s6 + $0x28] sm:$0xff] %v155_v5  ;;  %v181_v18 = vld [vmem:[%s1022_s5 + $0x110] sm:$0xff]  ;;  %v183_v19 = vld [vmem:[%s1022_s5 + $0x118] sm:$0xff]  ;;  %v185_v20 = vld [vmem:[%s1022_s5 + $0x120] sm:$0xff] }
  0x20   : > { %158 = vst [vmem:[%s1027_s6 + $0x30] sm:$0xff] %v157_v6  ;;  %v187_v21 = vld [vmem:[%s1022_s5 + $0x128] sm:$0xff]  ;;  %v189_v22 = vld [vmem:[%s1022_s5 + $0x130] sm:$0xff]  ;;  %v191_v23 = vld [vmem:[%s1022_s5 + $0x138] sm:$0xff] }
  0x21   : > { %160 = vst [vmem:[%s1027_s6 + $0x38] sm:$0xff] %v159_v7  ;;  %v193_v24 = vld [vmem:[%s1022_s5 + $0x180] sm:$0xff]  ;;  %v195_v25 = vld [vmem:[%s1022_s5 + $0x188] sm:$0xff]  ;;  %v197_v26 = vld [vmem:[%s1022_s5 + $0x190] sm:$0xff] }
  0x22   : > { %162 = vst [vmem:[%s1027_s6 + $0x40] sm:$0xff] %v161_v8  ;;  %v199_v27 = vld [vmem:[%s1022_s5 + $0x198] sm:$0xff]  ;;  %v201_v28 = vld [vmem:[%s1022_s5 + $0x1a0] sm:$0xff]  ;;  %v203_v29 = vld [vmem:[%s1022_s5 + $0x1a8] sm:$0xff] }
  0x23   : > { %164 = vst [vmem:[%s1027_s6 + $0x48] sm:$0xff] %v163_v9  ;;  %v205_v30 = vld [vmem:[%s1022_s5 + $0x1b0] sm:$0xff]  ;;  %v207_v31 = vld [vmem:[%s1022_s5 + $0x1b8] sm:$0xff]  ;;  %v209_v32 = vld [vmem:[%s1022_s5 + $0x200] sm:$0xff] }
  0x24   : > { %166 = vst [vmem:[%s1027_s6 + $0x50] sm:$0xff] %v165_v10  ;;  %v211_v33 = vld [vmem:[%s1022_s5 + $0x208] sm:$0xff]  ;;  %v213_v34 = vld [vmem:[%s1022_s5 + $0x210] sm:$0xff]  ;;  %v215_v35 = vld [vmem:[%s1022_s5 + $0x218] sm:$0xff] }
  0x25   : > { %168 = vst [vmem:[%s1027_s6 + $0x58] sm:$0xff] %v167_v11  ;;  %v217_v36 = vld [vmem:[%s1022_s5 + $0x220] sm:$0xff]  ;;  %v219_v37 = vld [vmem:[%s1022_s5 + $0x228] sm:$0xff]  ;;  %v221_v38 = vld [vmem:[%s1022_s5 + $0x230] sm:$0xff] }
  0x26   : > { %170 = vst [vmem:[%s1027_s6 + $0x60] sm:$0xff] %v169_v12  ;;  %v223_v39 = vld [vmem:[%s1022_s5 + $0x238] sm:$0xff]  ;;  %v225_v40 = vld [vmem:[%s1022_s5 + $0x280] sm:$0xff]  ;;  %v227_v41 = vld [vmem:[%s1022_s5 + $0x288] sm:$0xff] }
  0x27   : > { %172 = vst [vmem:[%s1027_s6 + $0x68] sm:$0xff] %v171_v13  ;;  %v229_v42 = vld [vmem:[%s1022_s5 + $0x290] sm:$0xff]  ;;  %v231_v43 = vld [vmem:[%s1022_s5 + $0x298] sm:$0xff]  ;;  %v233_v44 = vld [vmem:[%s1022_s5 + $0x2a0] sm:$0xff] }
  0x28   : > { %174 = vst [vmem:[%s1027_s6 + $0x70] sm:$0xff] %v173_v14  ;;  %v235_v45 = vld [vmem:[%s1022_s5 + $0x2a8] sm:$0xff]  ;;  %v237_v46 = vld [vmem:[%s1022_s5 + $0x2b0] sm:$0xff]  ;;  %v239_v47 = vld [vmem:[%s1022_s5 + $0x2b8] sm:$0xff] }
  0x29   : > { %176 = vst [vmem:[%s1027_s6 + $0x78] sm:$0xff] %v175_v15  ;;  %v241_v48 = vld [vmem:[%s1022_s5 + $0x300] sm:$0xff]  ;;  %v243_v49 = vld [vmem:[%s1022_s5 + $0x308] sm:$0xff]  ;;  %v245_v50 = vld [vmem:[%s1022_s5 + $0x310] sm:$0xff] }
  0x2a   : > { %178 = vst [vmem:[%s1027_s6 + $0x80] sm:$0xff] %v177_v16  ;;  %v247_v51 = vld [vmem:[%s1022_s5 + $0x318] sm:$0xff]  ;;  %v249_v52 = vld [vmem:[%s1022_s5 + $0x320] sm:$0xff]  ;;  %v251_v53 = vld [vmem:[%s1022_s5 + $0x328] sm:$0xff] }
  0x2b   : > { %180 = vst [vmem:[%s1027_s6 + $0x88] sm:$0xff] %v179_v17  ;;  %v253_v54 = vld [vmem:[%s1022_s5 + $0x330] sm:$0xff]  ;;  %v255_v55 = vld [vmem:[%s1022_s5 + $0x338] sm:$0xff]  ;;  %v257_v56 = vld [vmem:[%s1022_s5 + $0x380] sm:$0xff] }
  0x2c   : > { %182 = vst [vmem:[%s1027_s6 + $0x90] sm:$0xff] %v181_v18  ;;  %v259_v57 = vld [vmem:[%s1022_s5 + $0x388] sm:$0xff]  ;;  %v261_v58 = vld [vmem:[%s1022_s5 + $0x390] sm:$0xff]  ;;  %v263_v59 = vld [vmem:[%s1022_s5 + $0x398] sm:$0xff] }
  0x2d   : > { %184 = vst [vmem:[%s1027_s6 + $0x98] sm:$0xff] %v183_v19  ;;  %v265_v60 = vld [vmem:[%s1022_s5 + $0x3a0] sm:$0xff]  ;;  %v267_v61 = vld [vmem:[%s1022_s5 + $0x3a8] sm:$0xff]  ;;  %v269_v62 = vld [vmem:[%s1022_s5 + $0x3b0] sm:$0xff] }
  0x2e   : > { %186 = vst [vmem:[%s1027_s6 + $0xa0] sm:$0xff] %v185_v20  ;;  %v271_v63 = vld [vmem:[%s1022_s5 + $0x3b8] sm:$0xff] }
  0x2f   : > { %188 = vst [vmem:[%s1027_s6 + $0xa8] sm:$0xff] %v187_v21 }
  0x30   : > { %190 = vst [vmem:[%s1027_s6 + $0xb0] sm:$0xff] %v189_v22 }
  0x31   : > { %192 = vst [vmem:[%s1027_s6 + $0xb8] sm:$0xff] %v191_v23 }
  0x32   : > { %194 = vst [vmem:[%s1027_s6 + $0xc0] sm:$0xff] %v193_v24 }
  0x33   : > { %196 = vst [vmem:[%s1027_s6 + $0xc8] sm:$0xff] %v195_v25 }
  0x34   : > { %198 = vst [vmem:[%s1027_s6 + $0xd0] sm:$0xff] %v197_v26 }
  0x35   : > { %200 = vst [vmem:[%s1027_s6 + $0xd8] sm:$0xff] %v199_v27 }
  0x36   : > { %202 = vst [vmem:[%s1027_s6 + $0xe0] sm:$0xff] %v201_v28 }
  0x37   : > { %204 = vst [vmem:[%s1027_s6 + $0xe8] sm:$0xff] %v203_v29 }
  0x38   : > { %206 = vst [vmem:[%s1027_s6 + $0xf0] sm:$0xff] %v205_v30 }
  0x39   : > { %208 = vst [vmem:[%s1027_s6 + $0xf8] sm:$0xff] %v207_v31 }
  0x3a   : > { %210 = vst [vmem:[%s1027_s6 + $0x100] sm:$0xff] %v209_v32 }
  0x3b   : > { %212 = vst [vmem:[%s1027_s6 + $0x108] sm:$0xff] %v211_v33 }
  0x3c   : > { %214 = vst [vmem:[%s1027_s6 + $0x110] sm:$0xff] %v213_v34 }
  0x3d   : > { %216 = vst [vmem:[%s1027_s6 + $0x118] sm:$0xff] %v215_v35 }
  0x3e   : > { %218 = vst [vmem:[%s1027_s6 + $0x120] sm:$0xff] %v217_v36 }
  0x3f   : > { %220 = vst [vmem:[%s1027_s6 + $0x128] sm:$0xff] %v219_v37 }
  0x40   : > { %222 = vst [vmem:[%s1027_s6 + $0x130] sm:$0xff] %v221_v38 }
  0x41   : > { %224 = vst [vmem:[%s1027_s6 + $0x138] sm:$0xff] %v223_v39 }
  0x42   : > { %226 = vst [vmem:[%s1027_s6 + $0x140] sm:$0xff] %v225_v40 }
  0x43   : > { %228 = vst [vmem:[%s1027_s6 + $0x148] sm:$0xff] %v227_v41 }
  0x44   : > { %230 = vst [vmem:[%s1027_s6 + $0x150] sm:$0xff] %v229_v42 }
  0x45   : > { %232 = vst [vmem:[%s1027_s6 + $0x158] sm:$0xff] %v231_v43 }
  0x46   : > { %234 = vst [vmem:[%s1027_s6 + $0x160] sm:$0xff] %v233_v44 }
  0x47   : > { %236 = vst [vmem:[%s1027_s6 + $0x168] sm:$0xff] %v235_v45 }
  0x48   : > { %238 = vst [vmem:[%s1027_s6 + $0x170] sm:$0xff] %v237_v46 }
  0x49   : > { %240 = vst [vmem:[%s1027_s6 + $0x178] sm:$0xff] %v239_v47 }
  0x4a   : > { %242 = vst [vmem:[%s1027_s6 + $0x180] sm:$0xff] %v241_v48 }
  0x4b   : > { %244 = vst [vmem:[%s1027_s6 + $0x188] sm:$0xff] %v243_v49 }
  0x4c   : > { %246 = vst [vmem:[%s1027_s6 + $0x190] sm:$0xff] %v245_v50 }
  0x4d   : > { %248 = vst [vmem:[%s1027_s6 + $0x198] sm:$0xff] %v247_v51 }
  0x4e   : > { %250 = vst [vmem:[%s1027_s6 + $0x1a0] sm:$0xff] %v249_v52 }
  0x4f   : > { %252 = vst [vmem:[%s1027_s6 + $0x1a8] sm:$0xff] %v251_v53 }
  0x50   : > { %254 = vst [vmem:[%s1027_s6 + $0x1b0] sm:$0xff] %v253_v54 }
  0x51   : > { %256 = vst [vmem:[%s1027_s6 + $0x1b8] sm:$0xff] %v255_v55 }
  0x52   : > { %258 = vst [vmem:[%s1027_s6 + $0x1c0] sm:$0xff] %v257_v56 }
  0x53   : > { %260 = vst [vmem:[%s1027_s6 + $0x1c8] sm:$0xff] %v259_v57 }
  0x54   : > { %262 = vst [vmem:[%s1027_s6 + $0x1d0] sm:$0xff] %v261_v58 }
  0x55   : > { %264 = vst [vmem:[%s1027_s6 + $0x1d8] sm:$0xff] %v263_v59 }
  0x56   : > { %266 = vst [vmem:[%s1027_s6 + $0x1e0] sm:$0xff] %v265_v60 }
  0x57   : > { %268 = vst [vmem:[%s1027_s6 + $0x1e8] sm:$0xff] %v267_v61 }
  0x58   : > { %270 = vst [vmem:[%s1027_s6 + $0x1f0] sm:$0xff] %v269_v62 }
  0x59   : > { %272 = vst [vmem:[%s1027_s6 + $0x1f8] sm:$0xff] %v271_v63 }
  0x5a PF: > { %p813_p9 = scmp.ge.s32.totalorder %s939_s15, 1  ;;  %p285_p10 = scmp.lt.s32.totalorder %s939_s15, 5 }
  0x5c   : > { %p286_p11 = pnand %p813_p9, %p285_p10 }
  0x5d   : > { %p318_p12 = scmp.lt.s32.totalorder (!%p286_p11), %s927_s12, 1  ;;  %s292_s22 = sand.u32 (!%p286_p11), 1, %s915_s9  }
  0x5e   : > { %289 = sbr.rel (%p286_p11) target bundleno = 333 (0x14d), region = 47  ;;  %s814_s23 = sshll.u32 (!%p286_p11), %s292_s22, 9 }
  0x5f   : > { %s1162_s25 = scalar_lea.vmem (!%p286_p11), [#allocation2], %s814_s23  ;;  %s1172_s9 = scalar_lea.vmem (!%p286_p11), [#allocation3], %s814_s23 }
  0x63   : > { %v941_v0 = vmov 0   ;;  %s319_s7 = scalar_select %p318_p12, %s927_s12, 1  ;;  %v356_v9 = vld [vmem:[%s1162_s25 + $0x100] sm:$0xff]  ;;  %v357_v10 = vld [vmem:[%s1162_s25 + $0x108] sm:$0xff]  ;;  %v358_v11 = vld [vmem:[%s1162_s25 + $0x110] sm:$0xff] }
  0x64   : > { %883 = vset.pattern.permute.xlu1 %v941_v0  ;;  %882 = vset.pattern.permute.xlu0 %v941_v0  ;;  %v359_v12 = vld [vmem:[%s1162_s25 + $0x118] sm:$0xff]  ;;  %v360_v14 = vld [vmem:[%s1162_s25 + $0x120] sm:$0xff]  ;;  %v361_v15 = vld [vmem:[%s1162_s25 + $0x128] sm:$0xff]  ;;  %s819_s26 = sshll.u32 (%p1005_p6), %s923_s11, 3  ;;  %s820_s27 = sshll.u32 (%p1005_p6), %s927_s12, 7 }
  0x65   : > { %884 = vset.pattern.permute.xlu2 %v941_v0  ;;  %s824_s8 = sshll.u32 %s319_s7, 6  ;;  %v362_v19 = vld [vmem:[%s1162_s25 + $0x130] sm:$0xff]  ;;  %v363_v21 = vld [vmem:[%s1162_s25 + $0x138] sm:$0xff]  ;;  %v364_v27 = vld [vmem:[%s1162_s25 + $0x140] sm:$0xff]  ;;  %s573_s28 = sadd.s32 (%p1005_p6), %s820_s27, %s819_s26 }
  0x66   : > { %s322_s21 = scalar_lea.vmem %s1453_s1, %s824_s8  ;;  %v365_v28 = vld [vmem:[%s1162_s25 + $0x148] sm:$0xff]  ;;  %v366_v29 = vld [vmem:[%s1162_s25 + $0x150] sm:$0xff]  ;;  %v367_v30 = vld [vmem:[%s1162_s25 + $0x158] sm:$0xff]  ;;  %s821_s29 = sshll.u32 (%p1005_p6), %s573_s28, 3 }
  0x67   : > { %v390_v1 = vld [vmem:[%s322_s21 + $0x10] sm:$0xff]  ;;  %v388_v2 = vld [vmem:[%s322_s21] sm:$0xff]  ;;  %v391_v4 = vld [vmem:[%s322_s21 + $0x18] sm:$0xff]  ;;  %s1303_s3 = scalar_lea.vmem (%p1005_p6), %s1454_s2, %s821_s29 }
  0x68   : > { %408 = vperm.xlu1 %883, %v390_v1   ;;  %398 = vperm.xlu0 %882, %v388_v2   ;;  %v392_v3 = vld [vmem:[%s322_s21 + $0x20] sm:$0xff]  ;;  %v389_v5 = vld [vmem:[%s322_s21 + $0x8] sm:$0xff]  ;;  %v395_v7 = vld [vmem:[%s322_s21 + $0x38] sm:$0xff] }
  0x69   : > { %418 = vperm.xlu2 %884, %v392_v3   ;;  %v393_v6 = vld [vmem:[%s322_s21 + $0x28] sm:$0xff]  ;;  %v394_v8 = vld [vmem:[%s322_s21 + $0x30] sm:$0xff]  ;;  %v368_v31 = vld [vmem:[%s1162_s25 + $0x160] sm:$0xff] }
  0x6a   : > { %v369_v32 = vld [vmem:[%s1162_s25 + $0x168] sm:$0xff]  ;;  %v370_v36 = vld [vmem:[%s1162_s25 + $0x170] sm:$0xff]  ;;  %v371_v38 = vld [vmem:[%s1162_s25 + $0x178] sm:$0xff] }
  0x6b   : > { %v340_v43 = vld [vmem:[%s1162_s25 + $0x80] sm:$0xff]  ;;  %v341_v44 = vld [vmem:[%s1162_s25 + $0x88] sm:$0xff]  ;;  %v342_v45 = vld [vmem:[%s1162_s25 + $0x90] sm:$0xff] }
  0x6c   : > { %v343_v46 = vld [vmem:[%s1162_s25 + $0x98] sm:$0xff]  ;;  %v344_v48 = vld [vmem:[%s1162_s25 + $0xa0] sm:$0xff]  ;;  %v345_v49 = vld [vmem:[%s1162_s25 + $0xa8] sm:$0xff] }
  0x6d   : > { %v346_v53 = vld [vmem:[%s1162_s25 + $0xb0] sm:$0xff]  ;;  %v347_v55 = vld [vmem:[%s1162_s25 + $0xb8] sm:$0xff]  ;;  %v324_v59 = vld [vmem:[%s1162_s25] sm:$0xff] }
  0x6e   : > { %v325_v61 = vld [vmem:[%s1162_s25 + $0x8] sm:$0xff]  ;;  %v326_v63 = vld [vmem:[%s1162_s25 + $0x10] sm:$0xff]  ;;  %v327_v0 = vld [vmem:[%s1162_s25 + $0x18] sm:$0xff] }
  0x6f   : > { %v328_v2 = vld [vmem:[%s1162_s25 + $0x20] sm:$0xff] }
  0x70   : > { %413 = vperm.xlu1 %883, %v391_v4   ;;  %403 = vperm.xlu0 %882, %v389_v5   ;;  %v329_v4 = vld [vmem:[%s1162_s25 + $0x28] sm:$0xff] }
  0x71   : > { %423 = vperm.xlu2 %884, %v393_v6   ;;  %v330_v6 = vld [vmem:[%s1162_s25 + $0x30] sm:$0xff] }
  0x78   : > { %433 = vperm.xlu1 %883, %v395_v7   ;;  %428 = vperm.xlu0 %882, %v394_v8   ;;  %v331_v8 = vld [vmem:[%s1162_s25 + $0x38] sm:$0xff] }
  0xc3   : > { %v419_v13 = vpop.permute.xlu2 %418 }
  0xc4   : > { %v468_v16 = vmul.f32 %v419_v13, %v356_v9  ;;  %v469_v17 = vmul.f32 %v419_v13, %v357_v10  ;;  %v470_v18 = vmul.f32 %v419_v13, %v358_v11  ;;  %v471_v20 = vmul.f32 %v419_v13, %v359_v12  ;;  %v348_v12 = vld [vmem:[%s1162_s25 + $0xc0] sm:$0xff] }
  0xc5   : > { %v472_v22 = vmul.f32 %v419_v13, %v360_v14  ;;  %v473_v23 = vmul.f32 %v419_v13, %v361_v15  ;;  %v474_v24 = vmul.f32 %v419_v13, %v362_v19  ;;  %v475_v25 = vmul.f32 %v419_v13, %v363_v21  ;;  %v349_v14 = vld [vmem:[%s1162_s25 + $0xc8] sm:$0xff]  ;;  %v352_v19 = vld [vmem:[%s1162_s25 + $0xe0] sm:$0xff] }
  0xc6   : > { %532 = vst [vmem:[%s1172_s9 + $0x100] sm:$0xff] %v468_v16  ;;  %v350_v16 = vld [vmem:[%s1162_s25 + $0xd0] sm:$0xff]  ;;  %v353_v21 = vld [vmem:[%s1162_s25 + $0xe8] sm:$0xff] }
  0xc7   : > { %533 = vst [vmem:[%s1172_s9 + $0x108] sm:$0xff] %v469_v17  ;;  %v351_v17 = vld [vmem:[%s1162_s25 + $0xd8] sm:$0xff] }
  0xc8   : > { %534 = vst [vmem:[%s1172_s9 + $0x110] sm:$0xff] %v470_v18 }
  0xc9   : > { %535 = vst [vmem:[%s1172_s9 + $0x118] sm:$0xff] %v471_v20 }
  0xca   : > { %536 = vst [vmem:[%s1172_s9 + $0x120] sm:$0xff] %v472_v22 }
  0xcb   : > { %537 = vst [vmem:[%s1172_s9 + $0x128] sm:$0xff] %v473_v23  ;;  %v424_v26 = vpop.permute.xlu2 %423  ;;  %v354_v23 = vld [vmem:[%s1162_s25 + $0xf0] sm:$0xff] }
  0xcc   : > { %538 = vst [vmem:[%s1172_s9 + $0x130] sm:$0xff] %v474_v24  ;;  %v476_v33 = vmul.f32 %v424_v26, %v364_v27  ;;  %v477_v34 = vmul.f32 %v424_v26, %v365_v28  ;;  %v478_v35 = vmul.f32 %v424_v26, %v366_v29  ;;  %v479_v37 = vmul.f32 %v424_v26, %v367_v30  ;;  %v332_v29 = vld [vmem:[%s1162_s25 + $0x40] sm:$0xff] }
  0xcd   : > { %539 = vst [vmem:[%s1172_s9 + $0x138] sm:$0xff] %v475_v25  ;;  %v480_v39 = vmul.f32 %v424_v26, %v368_v31  ;;  %v481_v40 = vmul.f32 %v424_v26, %v369_v32  ;;  %v482_v41 = vmul.f32 %v424_v26, %v370_v36  ;;  %v483_v42 = vmul.f32 %v424_v26, %v371_v38  ;;  %v355_v25 = vld [vmem:[%s1162_s25 + $0xf8] sm:$0xff]  ;;  %v333_v31 = vld [vmem:[%s1162_s25 + $0x48] sm:$0xff]  ;;  %v336_v36 = vld [vmem:[%s1162_s25 + $0x60] sm:$0xff] }
  0xce   : > { %540 = vst [vmem:[%s1172_s9 + $0x140] sm:$0xff] %v476_v33  ;;  %v334_v33 = vld [vmem:[%s1162_s25 + $0x50] sm:$0xff]  ;;  %v337_v38 = vld [vmem:[%s1162_s25 + $0x68] sm:$0xff] }
  0xcf   : > { %541 = vst [vmem:[%s1172_s9 + $0x148] sm:$0xff] %v477_v34  ;;  %v335_v34 = vld [vmem:[%s1162_s25 + $0x58] sm:$0xff] }
  0xd0   : > { %542 = vst [vmem:[%s1172_s9 + $0x150] sm:$0xff] %v478_v35 }
  0xd1   : > { %543 = vst [vmem:[%s1172_s9 + $0x158] sm:$0xff] %v479_v37 }
  0xd2   : > { %544 = vst [vmem:[%s1172_s9 + $0x160] sm:$0xff] %v480_v39 }
  0xd3   : > { %545 = vst [vmem:[%s1172_s9 + $0x168] sm:$0xff] %v481_v40  ;;  %v338_v40 = vld [vmem:[%s1162_s25 + $0x70] sm:$0xff] }
  0xd4   : > { %546 = vst [vmem:[%s1172_s9 + $0x170] sm:$0xff] %v482_v41 }
  0xd5   : > { %547 = vst [vmem:[%s1172_s9 + $0x178] sm:$0xff] %v483_v42  ;;  %v339_v42 = vld [vmem:[%s1162_s25 + $0x78] sm:$0xff] }
  0xda   : > { %v409_v47 = vpop.permute.xlu1 %408  ;;  %v399_v58 = vpop.permute.xlu0 %398 }
  0xdb   : > { %v452_v50 = vmul.f32 %v409_v47, %v340_v43  ;;  %v453_v51 = vmul.f32 %v409_v47, %v341_v44  ;;  %v454_v52 = vmul.f32 %v409_v47, %v342_v45  ;;  %v455_v54 = vmul.f32 %v409_v47, %v343_v46  ;;  %v380_v46 = vld [vmem:[%s1162_s25 + $0x1c0] sm:$0xff] }
  0xdc   : > { %v456_v56 = vmul.f32 %v409_v47, %v344_v48  ;;  %v457_v57 = vmul.f32 %v409_v47, %v345_v49  ;;  %v458_v60 = vmul.f32 %v409_v47, %v346_v53  ;;  %v459_v62 = vmul.f32 %v409_v47, %v347_v55  ;;  %v381_v48 = vld [vmem:[%s1162_s25 + $0x1c8] sm:$0xff]  ;;  %v384_v53 = vld [vmem:[%s1162_s25 + $0x1e0] sm:$0xff] }
  0xdd   : > { %516 = vst [vmem:[%s1172_s9 + $0x80] sm:$0xff] %v452_v50  ;;  %v436_v1 = vmul.f32 %v399_v58, %v324_v59  ;;  %v437_v3 = vmul.f32 %v399_v58, %v325_v61  ;;  %v438_v5 = vmul.f32 %v399_v58, %v326_v63  ;;  %v439_v7 = vmul.f32 %v399_v58, %v327_v0  ;;  %v382_v50 = vld [vmem:[%s1162_s25 + $0x1d0] sm:$0xff]  ;;  %v385_v55 = vld [vmem:[%s1162_s25 + $0x1e8] sm:$0xff]  ;;  %v387_v59 = vld [vmem:[%s1162_s25 + $0x1f8] sm:$0xff] }
  0xde   : > { %517 = vst [vmem:[%s1172_s9 + $0x88] sm:$0xff] %v453_v51  ;;  %v440_v9 = vmul.f32 %v399_v58, %v328_v2  ;;  %v441_v10 = vmul.f32 %v399_v58, %v329_v4  ;;  %v442_v13 = vmul.f32 %v399_v58, %v330_v6  ;;  %v443_v15 = vmul.f32 %v399_v58, %v331_v8  ;;  %v383_v51 = vld [vmem:[%s1162_s25 + $0x1d8] sm:$0xff]  ;;  %v372_v63 = vld [vmem:[%s1162_s25 + $0x180] sm:$0xff]  ;;  %v377_v8 = vld [vmem:[%s1162_s25 + $0x1a8] sm:$0xff] }
  0xdf   : > { %518 = vst [vmem:[%s1172_s9 + $0x90] sm:$0xff] %v454_v52  ;;  %v375_v4 = vld [vmem:[%s1162_s25 + $0x198] sm:$0xff]  ;;  %v376_v6 = vld [vmem:[%s1162_s25 + $0x1a0] sm:$0xff] }
  0xe0   : > { %519 = vst [vmem:[%s1172_s9 + $0x98] sm:$0xff] %v455_v54 }
  0xe1   : > { %520 = vst [vmem:[%s1172_s9 + $0xa0] sm:$0xff] %v456_v56 }
  0xe2   : > { %521 = vst [vmem:[%s1172_s9 + $0xa8] sm:$0xff] %v457_v57  ;;  %v414_v11 = vpop.permute.xlu1 %413  ;;  %v404_v28 = vpop.permute.xlu0 %403  ;;  %v386_v57 = vld [vmem:[%s1162_s25 + $0x1f0] sm:$0xff] }
  0xe3   : > { %522 = vst [vmem:[%s1172_s9 + $0xb0] sm:$0xff] %v458_v60  ;;  %v460_v18 = vmul.f32 %v414_v11, %v348_v12  ;;  %v461_v20 = vmul.f32 %v414_v11, %v349_v14  ;;  %v462_v22 = vmul.f32 %v414_v11, %v350_v16  ;;  %v463_v24 = vmul.f32 %v414_v11, %v351_v17  ;;  %v379_v12 = vld [vmem:[%s1162_s25 + $0x1b8] sm:$0xff] }
  0xe4   : > { %523 = vst [vmem:[%s1172_s9 + $0xb8] sm:$0xff] %v459_v62  ;;  %v464_v26 = vmul.f32 %v414_v11, %v352_v19  ;;  %v465_v27 = vmul.f32 %v414_v11, %v353_v21  ;;  %v466_v30 = vmul.f32 %v414_v11, %v354_v23  ;;  %v467_v32 = vmul.f32 %v414_v11, %v355_v25 }
  0xe5   : > { %500 = vst [vmem:[%s1172_s9] sm:$0xff] %v436_v1  ;;  %v444_v35 = vmul.f32 %v404_v28, %v332_v29  ;;  %v445_v37 = vmul.f32 %v404_v28, %v333_v31  ;;  %v446_v39 = vmul.f32 %v404_v28, %v334_v33  ;;  %v447_v41 = vmul.f32 %v404_v28, %v335_v34  ;;  %v373_v1 = vld [vmem:[%s1162_s25 + $0x188] sm:$0xff]  ;;  %v620_v33 = vld [vmem:[%s1172_s9 + $0x80] sm:$0xff] (%p1005_p6) }
  0xe6   : > { %501 = vst [vmem:[%s1172_s9 + $0x8] sm:$0xff] %v437_v3  ;;  %v448_v43 = vmul.f32 %v404_v28, %v336_v36  ;;  %v449_v44 = vmul.f32 %v404_v28, %v337_v38  ;;  %v450_v47 = vmul.f32 %v404_v28, %v338_v40  ;;  %v451_v49 = vmul.f32 %v404_v28, %v339_v42  ;;  %v374_v3 = vld [vmem:[%s1162_s25 + $0x190] sm:$0xff]  ;;  %v622_v34 = vld [vmem:[%s1172_s9 + $0x88] sm:$0xff] (%p1005_p6) }
  0xe7   : > { %502 = vst [vmem:[%s1172_s9 + $0x10] sm:$0xff] %v438_v5  ;;  %v626_v36 = vld [vmem:[%s1172_s9 + $0x98] sm:$0xff] (%p1005_p6) }
  0xe8   : > { %503 = vst [vmem:[%s1172_s9 + $0x18] sm:$0xff] %v439_v7 }
  0xe9   : > { %504 = vst [vmem:[%s1172_s9 + $0x20] sm:$0xff] %v440_v9  ;;  %v630_v38 = vld [vmem:[%s1172_s9 + $0xa8] sm:$0xff] (%p1005_p6) }
  0xea   : > { %505 = vst [vmem:[%s1172_s9 + $0x28] sm:$0xff] %v441_v10  ;;  %v434_v45 = vpop.permute.xlu1 %433  ;;  %v429_v62 = vpop.permute.xlu0 %428  ;;  %v378_v10 = vld [vmem:[%s1162_s25 + $0x1b0] sm:$0xff] }
  0xeb   : > { %506 = vst [vmem:[%s1172_s9 + $0x30] sm:$0xff] %v442_v13  ;;  %v492_v52 = vmul.f32 %v434_v45, %v380_v46  ;;  %v493_v54 = vmul.f32 %v434_v45, %v381_v48  ;;  %v494_v56 = vmul.f32 %v434_v45, %v382_v50  ;;  %v495_v58 = vmul.f32 %v434_v45, %v383_v51  ;;  %v634_v40 = vld [vmem:[%s1172_s9 + $0xb8] sm:$0xff] (%p1005_p6)  ;;  %v654_v50 = vld [vmem:[%s1172_s9 + $0x108] sm:$0xff] (%p1005_p6)  ;;  %v656_v51 = vld [vmem:[%s1172_s9 + $0x110] sm:$0xff] (%p1005_p6) }
  0xec   : > { %507 = vst [vmem:[%s1172_s9 + $0x38] sm:$0xff] %v443_v15  ;;  %v496_v60 = vmul.f32 %v434_v45, %v384_v53  ;;  %v497_v61 = vmul.f32 %v434_v45, %v385_v55  ;;  %v498_v0 = vmul.f32 %v434_v45, %v386_v57  ;;  %v499_v2 = vmul.f32 %v434_v45, %v387_v59  ;;  %v588_v17 = vld [vmem:[%s1172_s9] sm:$0xff] (%p1005_p6)  ;;  %v664_v55 = vld [vmem:[%s1172_s9 + $0x130] sm:$0xff] (%p1005_p6) }
  0xed   : > { %524 = vst [vmem:[%s1172_s9 + $0xc0] sm:$0xff] %v460_v18  ;;  %v484_v5 = vmul.f32 %v429_v62, %v372_v63  ;;  %v485_v7 = vmul.f32 %v429_v62, %v373_v1  ;;  %v486_v9 = vmul.f32 %v429_v62, %v374_v3  ;;  %v487_v11 = vmul.f32 %v429_v62, %v375_v4  ;;  %v590_v18 = vld [vmem:[%s1172_s9 + $0x8] sm:$0xff] (%p1005_p6)  ;;  %v660_v53 = vld [vmem:[%s1172_s9 + $0x120] sm:$0xff] (%p1005_p6)  ;;  %v672_v59 = vld [vmem:[%s1172_s9 + $0x150] sm:$0xff] (%p1005_p6) }
  0xee   : > { %525 = vst [vmem:[%s1172_s9 + $0xc8] sm:$0xff] %v461_v20  ;;  %v488_v13 = vmul.f32 %v429_v62, %v376_v6  ;;  %v489_v14 = vmul.f32 %v429_v62, %v377_v8  ;;  %v490_v15 = vmul.f32 %v429_v62, %v378_v10  ;;  %v491_v16 = vmul.f32 %v429_v62, %v379_v12  ;;  %v592_v19 = vld [vmem:[%s1172_s9 + $0x10] sm:$0xff] (%p1005_p6)  ;;  %v668_v57 = vld [vmem:[%s1172_s9 + $0x140] sm:$0xff] (%p1005_p6)  ;;  %v678_v62 = vld [vmem:[%s1172_s9 + $0x168] sm:$0xff] (%p1005_p6) }
  0xef   : > { %526 = vst [vmem:[%s1172_s9 + $0xd0] sm:$0xff] %v462_v22  ;;  %v594_v20 = vld [vmem:[%s1172_s9 + $0x18] sm:$0xff] (%p1005_p6)  ;;  %v680_v63 = vld [vmem:[%s1172_s9 + $0x170] sm:$0xff] (%p1005_p6) }
  0xf0   : > { %527 = vst [vmem:[%s1172_s9 + $0xd8] sm:$0xff] %v463_v24  ;;  %v596_v21 = vld [vmem:[%s1172_s9 + $0x20] sm:$0xff] (%p1005_p6) }
  0xf1   : > { %528 = vst [vmem:[%s1172_s9 + $0xe0] sm:$0xff] %v464_v26  ;;  %v598_v22 = vld [vmem:[%s1172_s9 + $0x28] sm:$0xff] (%p1005_p6) }
  0xf2   : > { %529 = vst [vmem:[%s1172_s9 + $0xe8] sm:$0xff] %v465_v27  ;;  %v600_v23 = vld [vmem:[%s1172_s9 + $0x30] sm:$0xff] (%p1005_p6) }
  0xf3   : > { %530 = vst [vmem:[%s1172_s9 + $0xf0] sm:$0xff] %v466_v30  ;;  %v602_v24 = vld [vmem:[%s1172_s9 + $0x38] sm:$0xff] (%p1005_p6) }
  0xf4   : > { %531 = vst [vmem:[%s1172_s9 + $0xf8] sm:$0xff] %v467_v32 }
  0xf5   : > { %508 = vst [vmem:[%s1172_s9 + $0x40] sm:$0xff] %v444_v35  ;;  %v624_v35 = vld [vmem:[%s1172_s9 + $0x90] sm:$0xff] (%p1005_p6)  ;;  %v638_v42 = vld [vmem:[%s1172_s9 + $0xc8] sm:$0xff] (%p1005_p6) }
  0xf6   : > { %509 = vst [vmem:[%s1172_s9 + $0x48] sm:$0xff] %v445_v37  ;;  %v628_v37 = vld [vmem:[%s1172_s9 + $0xa0] sm:$0xff] (%p1005_p6) }
  0xf7   : > { %510 = vst [vmem:[%s1172_s9 + $0x50] sm:$0xff] %v446_v39  ;;  %v632_v39 = vld [vmem:[%s1172_s9 + $0xb0] sm:$0xff] (%p1005_p6) }
  0xf8   : > { %511 = vst [vmem:[%s1172_s9 + $0x58] sm:$0xff] %v447_v41  ;;  %v636_v41 = vld [vmem:[%s1172_s9 + $0xc0] sm:$0xff] (%p1005_p6) }
  0xf9   : > { %512 = vst [vmem:[%s1172_s9 + $0x60] sm:$0xff] %v448_v43  ;;  %v640_v43 = vld [vmem:[%s1172_s9 + $0xd0] sm:$0xff] (%p1005_p6)  ;;  %v644_v45 = vld [vmem:[%s1172_s9 + $0xe0] sm:$0xff] (%p1005_p6)  ;;  %v646_v46 = vld [vmem:[%s1172_s9 + $0xe8] sm:$0xff] (%p1005_p6) }
  0xfa   : > { %513 = vst [vmem:[%s1172_s9 + $0x68] sm:$0xff] %v449_v44  ;;  %v642_v44 = vld [vmem:[%s1172_s9 + $0xd8] sm:$0xff] (%p1005_p6) }
  0xfb   : > { %514 = vst [vmem:[%s1172_s9 + $0x70] sm:$0xff] %v450_v47  ;;  %v648_v47 = vld [vmem:[%s1172_s9 + $0xf0] sm:$0xff] (%p1005_p6)  ;;  %v650_v48 = vld [vmem:[%s1172_s9 + $0xf8] sm:$0xff] (%p1005_p6) }
  0xfc   : > { %515 = vst [vmem:[%s1172_s9 + $0x78] sm:$0xff] %v451_v49  ;;  %v604_v25 = vld [vmem:[%s1172_s9 + $0x40] sm:$0xff] (%p1005_p6) }
  0xfd   : > { %556 = vst [vmem:[%s1172_s9 + $0x1c0] sm:$0xff] %v492_v52  ;;  %v606_v26 = vld [vmem:[%s1172_s9 + $0x48] sm:$0xff] (%p1005_p6)  ;;  %v652_v49 = vld [vmem:[%s1172_s9 + $0x100] sm:$0xff] (%p1005_p6)  ;;  %v658_v52 = vld [vmem:[%s1172_s9 + $0x118] sm:$0xff] (%p1005_p6) }
  0xfe   : > { %557 = vst [vmem:[%s1172_s9 + $0x1c8] sm:$0xff] %v493_v54  ;;  %v608_v27 = vld [vmem:[%s1172_s9 + $0x50] sm:$0xff] (%p1005_p6)  ;;  %v662_v54 = vld [vmem:[%s1172_s9 + $0x128] sm:$0xff] (%p1005_p6) }
  0xff   : > { %558 = vst [vmem:[%s1172_s9 + $0x1d0] sm:$0xff] %v494_v56  ;;  %v610_v28 = vld [vmem:[%s1172_s9 + $0x58] sm:$0xff] (%p1005_p6) }
 0x100   : > { %559 = vst [vmem:[%s1172_s9 + $0x1d8] sm:$0xff] %v495_v58  ;;  %v612_v29 = vld [vmem:[%s1172_s9 + $0x60] sm:$0xff] (%p1005_p6)  ;;  %v666_v56 = vld [vmem:[%s1172_s9 + $0x138] sm:$0xff] (%p1005_p6)  ;;  %v670_v58 = vld [vmem:[%s1172_s9 + $0x148] sm:$0xff] (%p1005_p6) }
 0x101   : > { %560 = vst [vmem:[%s1172_s9 + $0x1e0] sm:$0xff] %v496_v60  ;;  %v614_v30 = vld [vmem:[%s1172_s9 + $0x68] sm:$0xff] (%p1005_p6)  ;;  %v674_v60 = vld [vmem:[%s1172_s9 + $0x158] sm:$0xff] (%p1005_p6) }
 0x102   : > { %561 = vst [vmem:[%s1172_s9 + $0x1e8] sm:$0xff] %v497_v61  ;;  %v616_v31 = vld [vmem:[%s1172_s9 + $0x70] sm:$0xff] (%p1005_p6)  ;;  %v676_v61 = vld [vmem:[%s1172_s9 + $0x160] sm:$0xff] (%p1005_p6) }
 0x103   : > { %562 = vst [vmem:[%s1172_s9 + $0x1f0] sm:$0xff] %v498_v0  ;;  %v618_v32 = vld [vmem:[%s1172_s9 + $0x78] sm:$0xff] (%p1005_p6) }
 0x104   : > { %563 = vst [vmem:[%s1172_s9 + $0x1f8] sm:$0xff] %v499_v2  ;;  %v682_v0 = vld [vmem:[%s1172_s9 + $0x178] sm:$0xff] (%p1005_p6) }
 0x105   : > { %548 = vst [vmem:[%s1172_s9 + $0x180] sm:$0xff] %v484_v5  ;;  %v702_v10 = vld [vmem:[%s1172_s9 + $0x1c8] sm:$0xff] (%p1005_p6) }
 0x106   : > { %549 = vst [vmem:[%s1172_s9 + $0x188] sm:$0xff] %v485_v7 }
 0x107   : > { %550 = vst [vmem:[%s1172_s9 + $0x190] sm:$0xff] %v486_v9  ;;  %v700_v9 = vld [vmem:[%s1172_s9 + $0x1c0] sm:$0xff] (%p1005_p6)  ;;  %v706_v12 = vld [vmem:[%s1172_s9 + $0x1d8] sm:$0xff] (%p1005_p6) }
 0x108   : > { %551 = vst [vmem:[%s1172_s9 + $0x198] sm:$0xff] %v487_v11  ;;  %570 = sbr.rel (!%p1005_p6) target bundleno = 333 (0x14d), region = 55  ;;  %v704_v11 = vld [vmem:[%s1172_s9 + $0x1d0] sm:$0xff] (%p1005_p6) }
 0x109   : > { %552 = vst [vmem:[%s1172_s9 + $0x1a0] sm:$0xff] %v488_v13  ;;  %v708_v13 = vld [vmem:[%s1172_s9 + $0x1e0] sm:$0xff] (%p1005_p6) }
 0x10a   : > { %553 = vst [vmem:[%s1172_s9 + $0x1a8] sm:$0xff] %v489_v14  ;;  %v710_v14 = vld [vmem:[%s1172_s9 + $0x1e8] sm:$0xff] (%p1005_p6) }
 0x10b   : > { %554 = vst [vmem:[%s1172_s9 + $0x1b0] sm:$0xff] %v490_v15  ;;  %v712_v15 = vld [vmem:[%s1172_s9 + $0x1f0] sm:$0xff] (%p1005_p6) }
 0x10c   : > { %555 = vst [vmem:[%s1172_s9 + $0x1b8] sm:$0xff] %v491_v16  ;;  %v684_v1 = vld [vmem:[%s1172_s9 + $0x180] sm:$0xff] (%p1005_p6)  ;;  %v714_v16 = vld [vmem:[%s1172_s9 + $0x1f8] sm:$0xff] (%p1005_p6) }
 0x10d   : > { %589 = vst [vmem:[%s1303_s3] sm:$0xff] %v588_v17  ;;  %v686_v2 = vld [vmem:[%s1172_s9 + $0x188] sm:$0xff] }
 0x10e   : > { %591 = vst [vmem:[%s1303_s3 + $0x8] sm:$0xff] %v590_v18  ;;  %v688_v3 = vld [vmem:[%s1172_s9 + $0x190] sm:$0xff] }
 0x10f   : > { %593 = vst [vmem:[%s1303_s3 + $0x10] sm:$0xff] %v592_v19  ;;  %v690_v4 = vld [vmem:[%s1172_s9 + $0x198] sm:$0xff] }
 0x110   : > { %595 = vst [vmem:[%s1303_s3 + $0x18] sm:$0xff] %v594_v20  ;;  %v692_v5 = vld [vmem:[%s1172_s9 + $0x1a0] sm:$0xff] }
 0x111   : > { %597 = vst [vmem:[%s1303_s3 + $0x20] sm:$0xff] %v596_v21  ;;  %v694_v6 = vld [vmem:[%s1172_s9 + $0x1a8] sm:$0xff] }
 0x112   : > { %599 = vst [vmem:[%s1303_s3 + $0x28] sm:$0xff] %v598_v22  ;;  %v696_v7 = vld [vmem:[%s1172_s9 + $0x1b0] sm:$0xff] }
 0x113   : > { %601 = vst [vmem:[%s1303_s3 + $0x30] sm:$0xff] %v600_v23  ;;  %v698_v8 = vld [vmem:[%s1172_s9 + $0x1b8] sm:$0xff] }
 0x114   : > { %603 = vst [vmem:[%s1303_s3 + $0x38] sm:$0xff] %v602_v24 }
 0x115   : > { %605 = vst [vmem:[%s1303_s3 + $0x80] sm:$0xff] %v604_v25 }
 0x116   : > { %607 = vst [vmem:[%s1303_s3 + $0x88] sm:$0xff] %v606_v26 }
 0x117   : > { %609 = vst [vmem:[%s1303_s3 + $0x90] sm:$0xff] %v608_v27 }
 0x118   : > { %611 = vst [vmem:[%s1303_s3 + $0x98] sm:$0xff] %v610_v28 }
 0x119   : > { %613 = vst [vmem:[%s1303_s3 + $0xa0] sm:$0xff] %v612_v29 }
 0x11a   : > { %615 = vst [vmem:[%s1303_s3 + $0xa8] sm:$0xff] %v614_v30 }
 0x11b   : > { %617 = vst [vmem:[%s1303_s3 + $0xb0] sm:$0xff] %v616_v31 }
 0x11c   : > { %619 = vst [vmem:[%s1303_s3 + $0xb8] sm:$0xff] %v618_v32 }
 0x11d   : > { %621 = vst [vmem:[%s1303_s3 + $0x100] sm:$0xff] %v620_v33 }
 0x11e   : > { %623 = vst [vmem:[%s1303_s3 + $0x108] sm:$0xff] %v622_v34 }
 0x11f   : > { %625 = vst [vmem:[%s1303_s3 + $0x110] sm:$0xff] %v624_v35 }
 0x120   : > { %627 = vst [vmem:[%s1303_s3 + $0x118] sm:$0xff] %v626_v36 }
 0x121   : > { %629 = vst [vmem:[%s1303_s3 + $0x120] sm:$0xff] %v628_v37 }
 0x122   : > { %631 = vst [vmem:[%s1303_s3 + $0x128] sm:$0xff] %v630_v38 }
 0x123   : > { %633 = vst [vmem:[%s1303_s3 + $0x130] sm:$0xff] %v632_v39 }
 0x124   : > { %635 = vst [vmem:[%s1303_s3 + $0x138] sm:$0xff] %v634_v40 }
 0x125   : > { %637 = vst [vmem:[%s1303_s3 + $0x180] sm:$0xff] %v636_v41 }
 0x126   : > { %639 = vst [vmem:[%s1303_s3 + $0x188] sm:$0xff] %v638_v42 }
 0x127   : > { %641 = vst [vmem:[%s1303_s3 + $0x190] sm:$0xff] %v640_v43 }
 0x128   : > { %643 = vst [vmem:[%s1303_s3 + $0x198] sm:$0xff] %v642_v44 }
 0x129   : > { %645 = vst [vmem:[%s1303_s3 + $0x1a0] sm:$0xff] %v644_v45 }
 0x12a   : > { %647 = vst [vmem:[%s1303_s3 + $0x1a8] sm:$0xff] %v646_v46 }
 0x12b   : > { %649 = vst [vmem:[%s1303_s3 + $0x1b0] sm:$0xff] %v648_v47 }
 0x12c   : > { %651 = vst [vmem:[%s1303_s3 + $0x1b8] sm:$0xff] %v650_v48 }
 0x12d   : > { %653 = vst [vmem:[%s1303_s3 + $0x200] sm:$0xff] %v652_v49 }
 0x12e   : > { %655 = vst [vmem:[%s1303_s3 + $0x208] sm:$0xff] %v654_v50 }
 0x12f   : > { %657 = vst [vmem:[%s1303_s3 + $0x210] sm:$0xff] %v656_v51 }
 0x130   : > { %659 = vst [vmem:[%s1303_s3 + $0x218] sm:$0xff] %v658_v52 }
 0x131   : > { %661 = vst [vmem:[%s1303_s3 + $0x220] sm:$0xff] %v660_v53 }
 0x132   : > { %663 = vst [vmem:[%s1303_s3 + $0x228] sm:$0xff] %v662_v54 }
 0x133   : > { %665 = vst [vmem:[%s1303_s3 + $0x230] sm:$0xff] %v664_v55 }
 0x134   : > { %667 = vst [vmem:[%s1303_s3 + $0x238] sm:$0xff] %v666_v56 }
 0x135   : > { %669 = vst [vmem:[%s1303_s3 + $0x280] sm:$0xff] %v668_v57 }
 0x136   : > { %671 = vst [vmem:[%s1303_s3 + $0x288] sm:$0xff] %v670_v58 }
 0x137   : > { %673 = vst [vmem:[%s1303_s3 + $0x290] sm:$0xff] %v672_v59 }
 0x138   : > { %675 = vst [vmem:[%s1303_s3 + $0x298] sm:$0xff] %v674_v60 }
 0x139   : > { %677 = vst [vmem:[%s1303_s3 + $0x2a0] sm:$0xff] %v676_v61 }
 0x13a   : > { %679 = vst [vmem:[%s1303_s3 + $0x2a8] sm:$0xff] %v678_v62 }
 0x13b   : > { %681 = vst [vmem:[%s1303_s3 + $0x2b0] sm:$0xff] %v680_v63 }
 0x13c   : > { %683 = vst [vmem:[%s1303_s3 + $0x2b8] sm:$0xff] %v682_v0 }
 0x13d   : > { %685 = vst [vmem:[%s1303_s3 + $0x300] sm:$0xff] %v684_v1 }
 0x13e   : > { %687 = vst [vmem:[%s1303_s3 + $0x308] sm:$0xff] %v686_v2 }
 0x13f   : > { %689 = vst [vmem:[%s1303_s3 + $0x310] sm:$0xff] %v688_v3 }
 0x140   : > { %691 = vst [vmem:[%s1303_s3 + $0x318] sm:$0xff] %v690_v4 }
 0x141   : > { %693 = vst [vmem:[%s1303_s3 + $0x320] sm:$0xff] %v692_v5 }
 0x142   : > { %695 = vst [vmem:[%s1303_s3 + $0x328] sm:$0xff] %v694_v6 }
 0x143   : > { %697 = vst [vmem:[%s1303_s3 + $0x330] sm:$0xff] %v696_v7 }
 0x144   : > { %699 = vst [vmem:[%s1303_s3 + $0x338] sm:$0xff] %v698_v8 }
 0x145   : > { %701 = vst [vmem:[%s1303_s3 + $0x380] sm:$0xff] %v700_v9 }
 0x146   : > { %703 = vst [vmem:[%s1303_s3 + $0x388] sm:$0xff] %v702_v10 }
 0x147   : > { %705 = vst [vmem:[%s1303_s3 + $0x390] sm:$0xff] %v704_v11 }
 0x148   : > { %707 = vst [vmem:[%s1303_s3 + $0x398] sm:$0xff] %v706_v12 }
 0x149   : > { %709 = vst [vmem:[%s1303_s3 + $0x3a0] sm:$0xff] %v708_v13 }
 0x14a   : > { %711 = vst [vmem:[%s1303_s3 + $0x3a8] sm:$0xff] %v710_v14 }
 0x14b   : > { %713 = vst [vmem:[%s1303_s3 + $0x3b0] sm:$0xff] %v712_v15 }
 0x14c   : > { %715 = vst [vmem:[%s1303_s3 + $0x3b8] sm:$0xff] %v714_v16 }
 0x14d PF: > { %s12_s15 = sadd.s32 1, %s939_s15   ;;  %s1456_s9 = smov %s919_s10 }
 0x14e   : > { %p9_p13 = scmp.ge.s32.totalorder %s12_s15, 6   ;;  %s1457_s10 = smov %s1013_s24 }
 0x14f   : > { %s1458_s11 = smov %s931_s13  ;;  %s1459_s12 = smov %s935_s14 }
 0x150   : > { %s1460_s13 = smov %s1463_s16  ;;  %s1461_s14 = smov %s1467_s17 }
 0x151   :  { %11 = sbr.rel (!%p9_p13) target bundleno = 4 (0x4), region = 112 }

</bundles_post_ra>
